<compile_context>
chip_gen: v5e
topology: v5e:2x2
jax: 0.10.0
libtpu: 0.0.40
codegen_flags: <defaults>
</compile_context>

<pallas_src>
import jax
import jax.numpy as jnp
from jax import lax
from jax.experimental import pallas as pl
from jax.experimental.pallas import tpu as pltpu


def _layer_norm(x, gamma, beta, eps=1e-6):
    mu = jnp.mean(x, axis=-1, keepdims=True)
    var = jnp.mean((x - mu) ** 2, axis=-1, keepdims=True)
    return (x - mu) * lax.rsqrt(var + eps) * gamma + beta


def _make_kernel(heads, d_k, d_v, d_model, tq):
    q_sz = heads * d_k
    k_sz = heads * d_k

    def kernel(x_ref, mask_ref,
               wqkv_ref, bqkv_ref,
               wo_ref, bo_ref,
               ln_g_ref, ln_b_ref,
               fln_g_ref, fln_b_ref,
               w1_ref, b1_ref, w2_ref, b2_ref,
               y_ref, attn_ref,
               qkv_scr):
        qi = pl.program_id(1)

        # ---- fused QKV projection for the full sequence, once per batch elem ----
        @pl.when(qi == 0)
        def _():
            x_all = x_ref[0].astype(jnp.bfloat16)                       # (S, D)
            qkv = jnp.dot(x_all, wqkv_ref[...],
                          preferred_element_type=jnp.float32)
            qkv = qkv + bqkv_ref[...]
            qkv_scr[...] = qkv.astype(jnp.bfloat16)

        row0 = pl.multiple_of(qi * tq, tq)
        x_tile = x_ref[0, pl.ds(row0, tq), :].astype(jnp.float32)       # (TQ, D)
        q_tile = qkv_scr[pl.ds(row0, tq), 0:q_sz]                       # (TQ, H*dk) bf16
        mask = mask_ref[0]                                              # (TQ, S) int32

        neg_big = jnp.float32(-1e18)
        context = jnp.zeros((tq, d_model), jnp.float32)
        for h in range(heads):                                          # static loop
            qh = q_tile[:, h * d_k:(h + 1) * d_k]                       # (TQ, dk) bf16
            kh = qkv_scr[:, q_sz + h * d_k: q_sz + (h + 1) * d_k]       # (S,  dk) bf16
            vh = qkv_scr[:, q_sz + k_sz + h * d_v:
                            q_sz + k_sz + (h + 1) * d_v]                # (S,  dv) bf16
            # q @ k^T without materializing a transpose (scale already in Wq).
            scores = lax.dot_general(qh, kh, (((1,), (1,)), ((), ())),
                                     preferred_element_type=jnp.float32)
            scores = jnp.where(mask != 0, neg_big, scores)
            scores = scores - jnp.max(scores, axis=-1, keepdims=True)
            e = jnp.exp(scores)
            p = e * pl.reciprocal(jnp.sum(e, axis=-1, keepdims=True),
                                  approx=True)
            attn_ref[0, h] = p.astype(attn_ref.dtype)
            ctx_h = jnp.dot(p.astype(jnp.bfloat16), vh,
                            preferred_element_type=jnp.float32)         # (TQ, dv)
            context = context + jnp.dot(ctx_h.astype(jnp.bfloat16), wo_ref[h],
                                        preferred_element_type=jnp.float32)
        context = context + bo_ref[...]

        # TODO(synk): dropout layers are identity (inference semantics).
        out1 = _layer_norm(context + x_tile, ln_g_ref[...], ln_b_ref[...])

        # ----- position-wise feed forward (pre-LN + residual), bf16 matmuls -----
        x2 = _layer_norm(out1, fln_g_ref[...], fln_b_ref[...])
        inter = jnp.dot(x2.astype(jnp.bfloat16), w1_ref[...],
                        preferred_element_type=jnp.float32) + b1_ref[...]
        inter = jnp.maximum(inter, 0.0)
        ff = jnp.dot(inter.astype(jnp.bfloat16), w2_ref[...],
                     preferred_element_type=jnp.float32) + b2_ref[...]
        y_ref[0] = (ff + out1).astype(y_ref.dtype)

    return kernel


def transformer_encoder_layer(x, mask, params, *, heads, d_k, d_v, q_tile=128):
    B, S, D = x.shape
    d_ff = params["w1"].shape[0]

    # Query tile: must divide S (fall back to the full sequence if it doesn't).
    tq = q_tile if (S % q_tile == 0) else S
    nq = S // tq

    # ----- parameter prep (one-time, outside the kernel) -----
    scale = 1.0 / jnp.sqrt(jnp.float32(d_k))
    wq_t = (params["wq"] * scale).T                                    # scale folded in
    bq = params["bq"] * scale
    w_qkv = jnp.concatenate([wq_t, params["wk"].T, params["wv"].T],
                            axis=1).astype(jnp.bfloat16)               # (D, 2*H*dk + H*dv)
    b_qkv = jnp.concatenate([bq, params["bk"], params["bv"]]
                            ).reshape(1, -1).astype(jnp.float32)
    wo3 = params["wo"].T.reshape(heads, d_v, D).astype(jnp.bfloat16)   # (H, dv, D)
    bo = params["bo"].reshape(1, -1).astype(jnp.float32)
    w1_t = params["w1"].T.astype(jnp.bfloat16)                         # (D, d_ff)
    b1 = params["b1"].reshape(1, -1).astype(jnp.float32)
    w2_t = params["w2"].T.astype(jnp.bfloat16)                         # (d_ff, D)
    b2 = params["b2"].reshape(1, -1).astype(jnp.float32)
    ln_g = params["ln_g"].reshape(1, -1).astype(jnp.float32)
    ln_b = params["ln_b"].reshape(1, -1).astype(jnp.float32)
    fln_g = params["fln_g"].reshape(1, -1).astype(jnp.float32)
    fln_b = params["fln_b"].reshape(1, -1).astype(jnp.float32)
    mask = mask.astype(jnp.int32)

    weight_args = (w_qkv, b_qkv, wo3, bo, ln_g, ln_b, fln_g, fln_b,
                   w1_t, b1, w2_t, b2)

    def full_spec(arr):
        nd = arr.ndim
        return pl.BlockSpec(arr.shape, lambda b, q, _n=nd: (0,) * _n)

    in_specs = [
        pl.BlockSpec((1, S, D), lambda b, q: (b, 0, 0)),     # x: full seq per batch
        pl.BlockSpec((1, tq, S), lambda b, q: (b, q, 0)),    # mask rows for the q tile
    ] + [full_spec(w) for w in weight_args]

    out_specs = [
        pl.BlockSpec((1, tq, D), lambda b, q: (b, q, 0)),
        pl.BlockSpec((1, heads, tq, S), lambda b, q: (b, 0, q, 0)),
    ]

    out_shape = (
        jax.ShapeDtypeStruct((B, S, D), x.dtype),
        jax.ShapeDtypeStruct((B, heads, S, S), jnp.float32),
    )

    qkv_width = 2 * heads * d_k + heads * d_v
    scratch_shapes = [pltpu.VMEM((S, qkv_width), jnp.bfloat16)]

    # Rough VMEM budget: double-buffered IO blocks + resident weights + scratch.
    io_bytes = 2 * (S * D * 4 + tq * S * 4 + tq * D * 4 + heads * tq * S * 4)
    w_bytes = sum(int(w.size) * w.dtype.itemsize for w in weight_args)
    scr_bytes = S * qkv_width * 2
    vmem_limit = int(min(64 * 2 ** 20,
                         max(32 * 2 ** 20, 2 * (io_bytes + w_bytes + scr_bytes))))

    flops = B * (2 * S * D * qkv_width                       # fused QKV projection
                 + 2 * heads * S * S * (d_k + d_v)           # scores + context
                 + 2 * S * heads * d_v * D                   # output projection
                 + 4 * S * D * d_ff)                         # FFN
    cost = pl.CostEstimate(
        flops=flops,
        transcendentals=B * heads * S * S,
        bytes_accessed=int(x.size * 4 + mask.size * 4 + w_bytes
                           + B * S * D * 4 + B * heads * S * S * 4))

    kernel = _make_kernel(heads, d_k, d_v, D, tq)
    return pl.pallas_call(
        kernel,
        out_shape=out_shape,
        grid_spec=pltpu.PrefetchScalarGridSpec(
            num_scalar_prefetch=0,
            grid=(B, nq),
            in_specs=in_specs,
            out_specs=out_specs,
            scratch_shapes=scratch_shapes,
        ),
        compiler_params=pltpu.CompilerParams(
            dimension_semantics=("parallel", "arbitrary"),
            vmem_limit_bytes=vmem_limit),
        cost_estimate=cost,
    )(x, mask, *weight_args)


# ---------------------------------------------------------------------------
# Pure-JAX f32 reference (mirrors the PyTorch forward) for verification.
# ---------------------------------------------------------------------------
def reference(x, mask, params, *, heads, d_k, d_v):
    B, S, D = x.shape
    q = x @ params["wq"].T + params["bq"]
    k = x @ params["wk"].T + params["bk"]
    v = x @ params["wv"].T + params["bv"]

    def split(t, dh):
        return t.reshape(B, S, heads, dh).transpose(0, 2, 1, 3)

    qh, kh, vh = split(q, d_k), split(k, d_k), split(v, d_v)
    qh = qh / jnp.sqrt(jnp.float32(d_k))
    scores = jnp.einsum("bhqd,bhkd->bhqk", qh, kh)
    scores = jnp.where(mask[:, None, :, :] != 0, jnp.float32(-1e18), scores)
    attn = jax.nn.softmax(scores, axis=-1)
    ctx = jnp.einsum("bhqk,bhkd->bhqd", attn, vh)
    ctx = ctx.transpose(0, 2, 1, 3).reshape(B, S, heads * d_v)
    context = ctx @ params["wo"].T + params["bo"]

    def ln(t, g, b, eps=1e-6):
        mu = t.mean(-1, keepdims=True)
        var = ((t - mu) ** 2).mean(-1, keepdims=True)
        return (t - mu) * lax.rsqrt(var + eps) * g + b

    out1 = ln(context + x, params["ln_g"], params["ln_b"])
    x2 = ln(out1, params["fln_g"], params["fln_b"])
    inter = jax.nn.relu(x2 @ params["w1"].T + params["b1"])
    y = inter @ params["w2"].T + params["b2"] + out1
    return y, attn


if __name__ == "__main__":
    # Small shapes consistent with the module; q_tile=8 -> 2 query tiles so the
    # scratch-reuse (qi > 0) path is actually exercised.
    B, S, D = 2, 16, 32          # batch, src_len, d_model
    HEADS, D_K, D_V, D_FF = 4, 8, 8, 64

    key = jax.random.PRNGKey(0)
    keys = jax.random.split(key, 16)

    def w(k, shape, scale=0.1):
        return (scale * jax.random.normal(k, shape)).astype(jnp.float32)

    params = {
        "wq": w(keys[0], (HEADS * D_K, D)), "bq": w(keys[1], (HEADS * D_K,)),
        "wk": w(keys[2], (HEADS * D_K, D)), "bk": w(keys[3], (HEADS * D_K,)),
        "wv": w(keys[4], (HEADS * D_V, D)), "bv": w(keys[5], (HEADS * D_V,)),
        "wo": w(keys[6], (D, HEADS * D_V)), "bo": w(keys[7], (D,)),
        "ln_g": jnp.ones((D,), jnp.float32), "ln_b": jnp.zeros((D,), jnp.float32),
        "fln_g": jnp.ones((D,), jnp.float32), "fln_b": jnp.zeros((D,), jnp.float32),
        "w1": w(keys[8], (D_FF, D)), "b1": w(keys[9], (D_FF,)),
        "w2": w(keys[10], (D, D_FF)), "b2": w(keys[11], (D,)),
    }

    x = w(keys[12], (B, S, D), scale=1.0)

    # padding-style mask: mask[b, i, j] = 1 where key position j is padded
    lengths = jnp.array([16, 11], dtype=jnp.int32)
    col = jnp.arange(S, dtype=jnp.int32)
    mask = (col[None, None, :] >= lengths[:, None, None]).astype(jnp.int32)
    mask = jnp.broadcast_to(mask, (B, S, S))

    y, attn = transformer_encoder_layer(x, mask, params,
                                        heads=HEADS, d_k=D_K, d_v=D_V, q_tile=8)
    jax.block_until_ready((y, attn))

    y_ref, attn_ref = reference(x, mask, params, heads=HEADS, d_k=D_K, d_v=D_V)
    # bf16 matmuls + approx reciprocal vs f32 reference -> loosened tolerances.
    assert jnp.allclose(y, y_ref, atol=2e-2, rtol=2e-2), "output mismatch"
    assert jnp.allclose(attn, attn_ref, atol=1e-2, rtol=1e-2), "attention mismatch"
    print("KERNEL_OK")
</pallas_src>

<mosaic_0001>
module attributes {stable_mosaic.version = 11 : i64} {
  func.func @kernel(%arg0: i32, %arg1: i32, %arg2: memref<1x16x32xf32, #tpu.memory_space<vmem>>, %arg3: memref<1x8x16xi32, #tpu.memory_space<vmem>>, %arg4: memref<32x96xbf16, #tpu.memory_space<vmem>>, %arg5: memref<1x96xf32, #tpu.memory_space<vmem>>, %arg6: memref<4x8x32xbf16, #tpu.memory_space<vmem>>, %arg7: memref<1x32xf32, #tpu.memory_space<vmem>>, %arg8: memref<1x32xf32, #tpu.memory_space<vmem>>, %arg9: memref<1x32xf32, #tpu.memory_space<vmem>>, %arg10: memref<1x32xf32, #tpu.memory_space<vmem>>, %arg11: memref<1x32xf32, #tpu.memory_space<vmem>>, %arg12: memref<32x64xbf16, #tpu.memory_space<vmem>>, %arg13: memref<1x64xf32, #tpu.memory_space<vmem>>, %arg14: memref<64x32xbf16, #tpu.memory_space<vmem>>, %arg15: memref<1x32xf32, #tpu.memory_space<vmem>>, %arg16: memref<1x8x32xf32, #tpu.memory_space<vmem>>, %arg17: memref<1x4x8x16xf32, #tpu.memory_space<vmem>>, %arg18: memref<16x96xbf16, #tpu.memory_space<vmem>>) attributes {dimension_semantics = [#tpu.dimension_semantics<parallel>, #tpu.dimension_semantics<arbitrary>], iteration_bounds = array<i64: 2, 2>, scalar_prefetch = 0 : i64, scratch_operands = 1 : i64, tpu.core_type = #tpu.core_type<tc>, window_params = [{transform_indices = @transform_0, window_bounds = array<i64: 1, 16, 32>}, {transform_indices = @transform_1, window_bounds = array<i64: 1, 8, 16>}, {pipeline_mode = #tpu.pipeline_mode<synchronous>, transform_indices = @transform_2, window_bounds = array<i64: 32, 96>}, {pipeline_mode = #tpu.pipeline_mode<synchronous>, transform_indices = @transform_3, window_bounds = array<i64: 1, 96>}, {pipeline_mode = #tpu.pipeline_mode<synchronous>, transform_indices = @transform_4, window_bounds = array<i64: 4, 8, 32>}, {pipeline_mode = #tpu.pipeline_mode<synchronous>, transform_indices = @transform_5, window_bounds = array<i64: 1, 32>}, {pipeline_mode = #tpu.pipeline_mode<synchronous>, transform_indices = @transform_6, window_bounds = array<i64: 1, 32>}, {pipeline_mode = #tpu.pipeline_mode<synchronous>, transform_indices = @transform_7, window_bounds = array<i64: 1, 32>}, {pipeline_mode = #tpu.pipeline_mode<synchronous>, transform_indices = @transform_8, window_bounds = array<i64: 1, 32>}, {pipeline_mode = #tpu.pipeline_mode<synchronous>, transform_indices = @transform_9, window_bounds = array<i64: 1, 32>}, {pipeline_mode = #tpu.pipeline_mode<synchronous>, transform_indices = @transform_10, window_bounds = array<i64: 32, 64>}, {pipeline_mode = #tpu.pipeline_mode<synchronous>, transform_indices = @transform_11, window_bounds = array<i64: 1, 64>}, {pipeline_mode = #tpu.pipeline_mode<synchronous>, transform_indices = @transform_12, window_bounds = array<i64: 64, 32>}, {pipeline_mode = #tpu.pipeline_mode<synchronous>, transform_indices = @transform_13, window_bounds = array<i64: 1, 32>}, {transform_indices = @transform_14, window_bounds = array<i64: 1, 8, 32>}, {transform_indices = @transform_15, window_bounds = array<i64: 1, 4, 8, 16>}]} {
    %c0_i32 = arith.constant 0 : i32
    %0 = arith.cmpi eq, %arg1, %c0_i32 : i32
    %1 = arith.extui %0 : i1 to i32
    %c0_i32_0 = arith.constant 0 : i32
    %2 = arith.cmpi ne, %1, %c0_i32_0 : i32
    scf.if %2 {
      %c0_101 = arith.constant 0 : index
      %c0_102 = arith.constant 0 : index
      %c0_103 = arith.constant 0 : index
      %195 = vector.load %arg2[%c0_101, %c0_102, %c0_103] : memref<1x16x32xf32, #tpu.memory_space<vmem>>, vector<1x16x32xf32>
      %196 = vector.shape_cast %195 : vector<1x16x32xf32> to vector<16x32xf32>
      %197 = arith.truncf %196 : vector<16x32xf32> to vector<16x32xbf16>
      %c0_104 = arith.constant 0 : index
      %c0_105 = arith.constant 0 : index
      %198 = vector.load %arg4[%c0_104, %c0_105] : memref<32x96xbf16, #tpu.memory_space<vmem>>, vector<32x96xbf16>
      %cst_106 = arith.constant dense<0.000000e+00> : vector<16x96xf32>
      %199 = tpu.matmul %197, %198, %cst_106 {dimension_numbers = #tpu.dot_dimension_numbers<[1], [0], [0], [1], [0, 0, 1, 1], [], []>} : vector<16x32xbf16>, vector<32x96xbf16>, vector<16x96xf32> -> vector<16x96xf32>
      %c0_107 = arith.constant 0 : index
      %c0_108 = arith.constant 0 : index
      %200 = vector.load %arg5[%c0_107, %c0_108] : memref<1x96xf32, #tpu.memory_space<vmem>>, vector<1x96xf32>
      %201 = vector.broadcast %200 : vector<1x96xf32> to vector<16x96xf32>
      %202 = arith.addf %199, %201 : vector<16x96xf32>
      %203 = arith.truncf %202 : vector<16x96xf32> to vector<16x96xbf16>
      %c0_109 = arith.constant 0 : index
      %c0_110 = arith.constant 0 : index
      %204 = vector.load %arg18[%c0_109, %c0_110] : memref<16x96xbf16, #tpu.memory_space<vmem>>, vector<16x96xbf16>
      tpu.vector_store %arg18[%c0_109, %c0_110], %203 {strides = array<i32>} : memref<16x96xbf16, #tpu.memory_space<vmem>>, vector<16x96xbf16>,
    } else {
    }
    %c8_i32 = arith.constant 8 : i32
    %3 = arith.muli %arg1, %c8_i32 : i32
    %4 = tpu.assume_multiple %3, 8 : i32
    %c0 = arith.constant 0 : index
    %5 = arith.index_cast %4 : i32 to index
    %c0_1 = arith.constant 0 : index
    %6 = vector.load %arg2[%c0, %5, %c0_1] : memref<1x16x32xf32, #tpu.memory_space<vmem>>, vector<1x8x32xf32>
    %7 = vector.shape_cast %6 : vector<1x8x32xf32> to vector<8x32xf32>
    %8 = arith.index_cast %4 : i32 to index
    %c0_2 = arith.constant 0 : index
    %9 = vector.load %arg18[%8, %c0_2] : memref<16x96xbf16, #tpu.memory_space<vmem>>, vector<8x32xbf16>
    %c0_3 = arith.constant 0 : index
    %c0_4 = arith.constant 0 : index
    %c0_5 = arith.constant 0 : index
    %10 = vector.load %arg3[%c0_3, %c0_4, %c0_5] : memref<1x8x16xi32, #tpu.memory_space<vmem>>, vector<1x8x16xi32>
    %11 = vector.shape_cast %10 : vector<1x8x16xi32> to vector<8x16xi32>
    %cst = arith.constant 0.000000e+00 : f32
    %12 = vector.broadcast %cst : f32 to vector<8x32xf32>
    %13 = vector.extract_strided_slice %9 {offsets = [0, 0], sizes = [8, 8], strides = [1, 1]} : vector<8x32xbf16> to vector<8x8xbf16>
    %c0_6 = arith.constant 0 : index
    %c32 = arith.constant 32 : index
    %14 = vector.load %arg18[%c0_6, %c32] : memref<16x96xbf16, #tpu.memory_space<vmem>>, vector<16x8xbf16>
    %c0_7 = arith.constant 0 : index
    %c64 = arith.constant 64 : index
    %15 = vector.load %arg18[%c0_7, %c64] : memref<16x96xbf16, #tpu.memory_space<vmem>>, vector<16x8xbf16>
    %cst_8 = arith.constant dense<0.000000e+00> : vector<8x16xf32>
    %16 = tpu.matmul %13, %14, %cst_8 {dimension_numbers = #tpu.dot_dimension_numbers<[1], [1], [0], [0], [0, 0, 1, 0], [], []>} : vector<8x8xbf16>, vector<16x8xbf16>, vector<8x16xf32> -> vector<8x16xf32>
    %c0_i32_9 = arith.constant 0 : i32
    %17 = vector.broadcast %c0_i32_9 : i32 to vector<8x16xi32>
    %18 = arith.cmpi ne, %11, %17 : vector<8x16xi32>
    %cst_10 = arith.constant -9.99999984E+17 : f32
    %19 = vector.broadcast %cst_10 : f32 to vector<8x16xf32>
    %20 = arith.select %18, %19, %16 : vector<8x16xi1>, vector<8x16xf32>
    %cst_11 = arith.constant dense<0xFF800000> : vector<8xf32>
    %21 = vector.multi_reduction <maximumf>, %20, %cst_11 [1] : vector<8x16xf32> to vector<8xf32>
    %22 = vector.shape_cast %21 : vector<8xf32> to vector<8x1xf32>
    %23 = vector.broadcast %22 : vector<8x1xf32> to vector<8x16xf32>
    %24 = arith.subf %20, %23 : vector<8x16xf32>
    %25 = math.exp %24 : vector<8x16xf32>
    %cst_12 = arith.constant dense<0.000000e+00> : vector<8xf32>
    %26 = vector.multi_reduction <add>, %25, %cst_12 [1] : vector<8x16xf32> to vector<8xf32>
    %27 = vector.shape_cast %26 : vector<8xf32> to vector<8x1xf32>
    %28 = tpu.reciprocal %27 {approx = true} : vector<8x1xf32> -> vector<8x1xf32>
    %29 = vector.broadcast %28 : vector<8x1xf32> to vector<8x16xf32>
    %30 = arith.mulf %25, %29 : vector<8x16xf32>
    %c0_13 = arith.constant 0 : index
    %c0_14 = arith.constant 0 : index
    %c0_15 = arith.constant 0 : index
    %c0_16 = arith.constant 0 : index
    %31 = vector.load %arg17[%c0_13, %c0_14, %c0_15, %c0_16] : memref<1x4x8x16xf32, #tpu.memory_space<vmem>>, vector<1x1x8x16xf32>
    %32 = vector.shape_cast %31 : vector<1x1x8x16xf32> to vector<8x16xf32>
    %33 = vector.shape_cast %30 : vector<8x16xf32> to vector<1x1x8x16xf32>
    tpu.vector_store %arg17[%c0_13, %c0_14, %c0_15, %c0_16], %33 {strides = array<i32>} : memref<1x4x8x16xf32, #tpu.memory_space<vmem>>, vector<1x1x8x16xf32>,
    %34 = arith.truncf %30 : vector<8x16xf32> to vector<8x16xbf16>
    %cst_17 = arith.constant dense<0.000000e+00> : vector<8x8xf32>
    %35 = tpu.matmul %34, %15, %cst_17 {dimension_numbers = #tpu.dot_dimension_numbers<[1], [0], [0], [1], [0, 0, 1, 1], [], []>} : vector<8x16xbf16>, vector<16x8xbf16>, vector<8x8xf32> -> vector<8x8xf32>
    %36 = arith.truncf %35 : vector<8x8xf32> to vector<8x8xbf16>
    %c0_18 = arith.constant 0 : index
    %c0_19 = arith.constant 0 : index
    %c0_20 = arith.constant 0 : index
    %37 = vector.load %arg6[%c0_18, %c0_19, %c0_20] : memref<4x8x32xbf16, #tpu.memory_space<vmem>>, vector<1x8x32xbf16>
    %38 = vector.shape_cast %37 : vector<1x8x32xbf16> to vector<8x32xbf16>
    %cst_21 = arith.constant dense<0.000000e+00> : vector<8x32xf32>
    %39 = tpu.matmul %36, %38, %cst_21 {dimension_numbers = #tpu.dot_dimension_numbers<[1], [0], [0], [1], [0, 0, 1, 1], [], []>} : vector<8x8xbf16>, vector<8x32xbf16>, vector<8x32xf32> -> vector<8x32xf32>
    %40 = arith.addf %12, %39 : vector<8x32xf32>
    %41 = vector.extract_strided_slice %9 {offsets = [0, 8], sizes = [8, 8], strides = [1, 1]} : vector<8x32xbf16> to vector<8x8xbf16>
    %c0_22 = arith.constant 0 : index
    %c40 = arith.constant 40 : index
    %42 = vector.load %arg18[%c0_22, %c40] : memref<16x96xbf16, #tpu.memory_space<vmem>>, vector<16x8xbf16>
    %c0_23 = arith.constant 0 : index
    %c72 = arith.constant 72 : index
    %43 = vector.load %arg18[%c0_23, %c72] : memref<16x96xbf16, #tpu.memory_space<vmem>>, vector<16x8xbf16>
    %cst_24 = arith.constant dense<0.000000e+00> : vector<8x16xf32>
    %44 = tpu.matmul %41, %42, %cst_24 {dimension_numbers = #tpu.dot_dimension_numbers<[1], [1], [0], [0], [0, 0, 1, 0], [], []>} : vector<8x8xbf16>, vector<16x8xbf16>, vector<8x16xf32> -> vector<8x16xf32>
    %c0_i32_25 = arith.constant 0 : i32
    %45 = vector.broadcast %c0_i32_25 : i32 to vector<8x16xi32>
    %46 = arith.cmpi ne, %11, %45 : vector<8x16xi32>
    %cst_26 = arith.constant -9.99999984E+17 : f32
    %47 = vector.broadcast %cst_26 : f32 to vector<8x16xf32>
    %48 = arith.select %46, %47, %44 : vector<8x16xi1>, vector<8x16xf32>
    %cst_27 = arith.constant dense<0xFF800000> : vector<8xf32>
    %49 = vector.multi_reduction <maximumf>, %48, %cst_27 [1] : vector<8x16xf32> to vector<8xf32>
    %50 = vector.shape_cast %49 : vector<8xf32> to vector<8x1xf32>
    %51 = vector.broadcast %50 : vector<8x1xf32> to vector<8x16xf32>
    %52 = arith.subf %48, %51 : vector<8x16xf32>
    %53 = math.exp %52 : vector<8x16xf32>
    %cst_28 = arith.constant dense<0.000000e+00> : vector<8xf32>
    %54 = vector.multi_reduction <add>, %53, %cst_28 [1] : vector<8x16xf32> to vector<8xf32>
    %55 = vector.shape_cast %54 : vector<8xf32> to vector<8x1xf32>
    %56 = tpu.reciprocal %55 {approx = true} : vector<8x1xf32> -> vector<8x1xf32>
    %57 = vector.broadcast %56 : vector<8x1xf32> to vector<8x16xf32>
    %58 = arith.mulf %53, %57 : vector<8x16xf32>
    %c0_29 = arith.constant 0 : index
    %c1 = arith.constant 1 : index
    %c0_30 = arith.constant 0 : index
    %c0_31 = arith.constant 0 : index
    %59 = vector.load %arg17[%c0_29, %c1, %c0_30, %c0_31] : memref<1x4x8x16xf32, #tpu.memory_space<vmem>>, vector<1x1x8x16xf32>
    %60 = vector.shape_cast %59 : vector<1x1x8x16xf32> to vector<8x16xf32>
    %61 = vector.shape_cast %58 : vector<8x16xf32> to vector<1x1x8x16xf32>
    tpu.vector_store %arg17[%c0_29, %c1, %c0_30, %c0_31], %61 {strides = array<i32>} : memref<1x4x8x16xf32, #tpu.memory_space<vmem>>, vector<1x1x8x16xf32>,
    %62 = arith.truncf %58 : vector<8x16xf32> to vector<8x16xbf16>
    %cst_32 = arith.constant dense<0.000000e+00> : vector<8x8xf32>
    %63 = tpu.matmul %62, %43, %cst_32 {dimension_numbers = #tpu.dot_dimension_numbers<[1], [0], [0], [1], [0, 0, 1, 1], [], []>} : vector<8x16xbf16>, vector<16x8xbf16>, vector<8x8xf32> -> vector<8x8xf32>
    %64 = arith.truncf %63 : vector<8x8xf32> to vector<8x8xbf16>
    %c1_33 = arith.constant 1 : index
    %c0_34 = arith.constant 0 : index
    %c0_35 = arith.constant 0 : index
    %65 = vector.load %arg6[%c1_33, %c0_34, %c0_35] : memref<4x8x32xbf16, #tpu.memory_space<vmem>>, vector<1x8x32xbf16>
    %66 = vector.shape_cast %65 : vector<1x8x32xbf16> to vector<8x32xbf16>
    %cst_36 = arith.constant dense<0.000000e+00> : vector<8x32xf32>
    %67 = tpu.matmul %64, %66, %cst_36 {dimension_numbers = #tpu.dot_dimension_numbers<[1], [0], [0], [1], [0, 0, 1, 1], [], []>} : vector<8x8xbf16>, vector<8x32xbf16>, vector<8x32xf32> -> vector<8x32xf32>
    %68 = arith.addf %40, %67 : vector<8x32xf32>
    %69 = vector.extract_strided_slice %9 {offsets = [0, 16], sizes = [8, 8], strides = [1, 1]} : vector<8x32xbf16> to vector<8x8xbf16>
    %c0_37 = arith.constant 0 : index
    %c48 = arith.constant 48 : index
    %70 = vector.load %arg18[%c0_37, %c48] : memref<16x96xbf16, #tpu.memory_space<vmem>>, vector<16x8xbf16>
    %c0_38 = arith.constant 0 : index
    %c80 = arith.constant 80 : index
    %71 = vector.load %arg18[%c0_38, %c80] : memref<16x96xbf16, #tpu.memory_space<vmem>>, vector<16x8xbf16>
    %cst_39 = arith.constant dense<0.000000e+00> : vector<8x16xf32>
    %72 = tpu.matmul %69, %70, %cst_39 {dimension_numbers = #tpu.dot_dimension_numbers<[1], [1], [0], [0], [0, 0, 1, 0], [], []>} : vector<8x8xbf16>, vector<16x8xbf16>, vector<8x16xf32> -> vector<8x16xf32>
    %c0_i32_40 = arith.constant 0 : i32
    %73 = vector.broadcast %c0_i32_40 : i32 to vector<8x16xi32>
    %74 = arith.cmpi ne, %11, %73 : vector<8x16xi32>
    %cst_41 = arith.constant -9.99999984E+17 : f32
    %75 = vector.broadcast %cst_41 : f32 to vector<8x16xf32>
    %76 = arith.select %74, %75, %72 : vector<8x16xi1>, vector<8x16xf32>
    %cst_42 = arith.constant dense<0xFF800000> : vector<8xf32>
    %77 = vector.multi_reduction <maximumf>, %76, %cst_42 [1] : vector<8x16xf32> to vector<8xf32>
    %78 = vector.shape_cast %77 : vector<8xf32> to vector<8x1xf32>
    %79 = vector.broadcast %78 : vector<8x1xf32> to vector<8x16xf32>
    %80 = arith.subf %76, %79 : vector<8x16xf32>
    %81 = math.exp %80 : vector<8x16xf32>
    %cst_43 = arith.constant dense<0.000000e+00> : vector<8xf32>
    %82 = vector.multi_reduction <add>, %81, %cst_43 [1] : vector<8x16xf32> to vector<8xf32>
    %83 = vector.shape_cast %82 : vector<8xf32> to vector<8x1xf32>
    %84 = tpu.reciprocal %83 {approx = true} : vector<8x1xf32> -> vector<8x1xf32>
    %85 = vector.broadcast %84 : vector<8x1xf32> to vector<8x16xf32>
    %86 = arith.mulf %81, %85 : vector<8x16xf32>
    %c0_44 = arith.constant 0 : index
    %c2 = arith.constant 2 : index
    %c0_45 = arith.constant 0 : index
    %c0_46 = arith.constant 0 : index
    %87 = vector.load %arg17[%c0_44, %c2, %c0_45, %c0_46] : memref<1x4x8x16xf32, #tpu.memory_space<vmem>>, vector<1x1x8x16xf32>
    %88 = vector.shape_cast %87 : vector<1x1x8x16xf32> to vector<8x16xf32>
    %89 = vector.shape_cast %86 : vector<8x16xf32> to vector<1x1x8x16xf32>
    tpu.vector_store %arg17[%c0_44, %c2, %c0_45, %c0_46], %89 {strides = array<i32>} : memref<1x4x8x16xf32, #tpu.memory_space<vmem>>, vector<1x1x8x16xf32>,
    %90 = arith.truncf %86 : vector<8x16xf32> to vector<8x16xbf16>
    %cst_47 = arith.constant dense<0.000000e+00> : vector<8x8xf32>
    %91 = tpu.matmul %90, %71, %cst_47 {dimension_numbers = #tpu.dot_dimension_numbers<[1], [0], [0], [1], [0, 0, 1, 1], [], []>} : vector<8x16xbf16>, vector<16x8xbf16>, vector<8x8xf32> -> vector<8x8xf32>
    %92 = arith.truncf %91 : vector<8x8xf32> to vector<8x8xbf16>
    %c2_48 = arith.constant 2 : index
    %c0_49 = arith.constant 0 : index
    %c0_50 = arith.constant 0 : index
    %93 = vector.load %arg6[%c2_48, %c0_49, %c0_50] : memref<4x8x32xbf16, #tpu.memory_space<vmem>>, vector<1x8x32xbf16>
    %94 = vector.shape_cast %93 : vector<1x8x32xbf16> to vector<8x32xbf16>
    %cst_51 = arith.constant dense<0.000000e+00> : vector<8x32xf32>
    %95 = tpu.matmul %92, %94, %cst_51 {dimension_numbers = #tpu.dot_dimension_numbers<[1], [0], [0], [1], [0, 0, 1, 1], [], []>} : vector<8x8xbf16>, vector<8x32xbf16>, vector<8x32xf32> -> vector<8x32xf32>
    %96 = arith.addf %68, %95 : vector<8x32xf32>
    %97 = vector.extract_strided_slice %9 {offsets = [0, 24], sizes = [8, 8], strides = [1, 1]} : vector<8x32xbf16> to vector<8x8xbf16>
    %c0_52 = arith.constant 0 : index
    %c56 = arith.constant 56 : index
    %98 = vector.load %arg18[%c0_52, %c56] : memref<16x96xbf16, #tpu.memory_space<vmem>>, vector<16x8xbf16>
    %c0_53 = arith.constant 0 : index
    %c88 = arith.constant 88 : index
    %99 = vector.load %arg18[%c0_53, %c88] : memref<16x96xbf16, #tpu.memory_space<vmem>>, vector<16x8xbf16>
    %cst_54 = arith.constant dense<0.000000e+00> : vector<8x16xf32>
    %100 = tpu.matmul %97, %98, %cst_54 {dimension_numbers = #tpu.dot_dimension_numbers<[1], [1], [0], [0], [0, 0, 1, 0], [], []>} : vector<8x8xbf16>, vector<16x8xbf16>, vector<8x16xf32> -> vector<8x16xf32>
    %c0_i32_55 = arith.constant 0 : i32
    %101 = vector.broadcast %c0_i32_55 : i32 to vector<8x16xi32>
    %102 = arith.cmpi ne, %11, %101 : vector<8x16xi32>
    %cst_56 = arith.constant -9.99999984E+17 : f32
    %103 = vector.broadcast %cst_56 : f32 to vector<8x16xf32>
    %104 = arith.select %102, %103, %100 : vector<8x16xi1>, vector<8x16xf32>
    %cst_57 = arith.constant dense<0xFF800000> : vector<8xf32>
    %105 = vector.multi_reduction <maximumf>, %104, %cst_57 [1] : vector<8x16xf32> to vector<8xf32>
    %106 = vector.shape_cast %105 : vector<8xf32> to vector<8x1xf32>
    %107 = vector.broadcast %106 : vector<8x1xf32> to vector<8x16xf32>
    %108 = arith.subf %104, %107 : vector<8x16xf32>
    %109 = math.exp %108 : vector<8x16xf32>
    %cst_58 = arith.constant dense<0.000000e+00> : vector<8xf32>
    %110 = vector.multi_reduction <add>, %109, %cst_58 [1] : vector<8x16xf32> to vector<8xf32>
    %111 = vector.shape_cast %110 : vector<8xf32> to vector<8x1xf32>
    %112 = tpu.reciprocal %111 {approx = true} : vector<8x1xf32> -> vector<8x1xf32>
    %113 = vector.broadcast %112 : vector<8x1xf32> to vector<8x16xf32>
    %114 = arith.mulf %109, %113 : vector<8x16xf32>
    %c0_59 = arith.constant 0 : index
    %c3 = arith.constant 3 : index
    %c0_60 = arith.constant 0 : index
    %c0_61 = arith.constant 0 : index
    %115 = vector.load %arg17[%c0_59, %c3, %c0_60, %c0_61] : memref<1x4x8x16xf32, #tpu.memory_space<vmem>>, vector<1x1x8x16xf32>
    %116 = vector.shape_cast %115 : vector<1x1x8x16xf32> to vector<8x16xf32>
    %117 = vector.shape_cast %114 : vector<8x16xf32> to vector<1x1x8x16xf32>
    tpu.vector_store %arg17[%c0_59, %c3, %c0_60, %c0_61], %117 {strides = array<i32>} : memref<1x4x8x16xf32, #tpu.memory_space<vmem>>, vector<1x1x8x16xf32>,
    %118 = arith.truncf %114 : vector<8x16xf32> to vector<8x16xbf16>
    %cst_62 = arith.constant dense<0.000000e+00> : vector<8x8xf32>
    %119 = tpu.matmul %118, %99, %cst_62 {dimension_numbers = #tpu.dot_dimension_numbers<[1], [0], [0], [1], [0, 0, 1, 1], [], []>} : vector<8x16xbf16>, vector<16x8xbf16>, vector<8x8xf32> -> vector<8x8xf32>
    %120 = arith.truncf %119 : vector<8x8xf32> to vector<8x8xbf16>
    %c3_63 = arith.constant 3 : index
    %c0_64 = arith.constant 0 : index
    %c0_65 = arith.constant 0 : index
    %121 = vector.load %arg6[%c3_63, %c0_64, %c0_65] : memref<4x8x32xbf16, #tpu.memory_space<vmem>>, vector<1x8x32xbf16>
    %122 = vector.shape_cast %121 : vector<1x8x32xbf16> to vector<8x32xbf16>
    %cst_66 = arith.constant dense<0.000000e+00> : vector<8x32xf32>
    %123 = tpu.matmul %120, %122, %cst_66 {dimension_numbers = #tpu.dot_dimension_numbers<[1], [0], [0], [1], [0, 0, 1, 1], [], []>} : vector<8x8xbf16>, vector<8x32xbf16>, vector<8x32xf32> -> vector<8x32xf32>
    %124 = arith.addf %96, %123 : vector<8x32xf32>
    %c0_67 = arith.constant 0 : index
    %c0_68 = arith.constant 0 : index
    %125 = vector.load %arg7[%c0_67, %c0_68] : memref<1x32xf32, #tpu.memory_space<vmem>>, vector<1x32xf32>
    %126 = vector.broadcast %125 : vector<1x32xf32> to vector<8x32xf32>
    %127 = arith.addf %124, %126 : vector<8x32xf32>
    %128 = arith.addf %127, %7 : vector<8x32xf32>
    %c0_69 = arith.constant 0 : index
    %c0_70 = arith.constant 0 : index
    %129 = vector.load %arg8[%c0_69, %c0_70] : memref<1x32xf32, #tpu.memory_space<vmem>>, vector<1x32xf32>
    %c0_71 = arith.constant 0 : index
    %c0_72 = arith.constant 0 : index
    %130 = vector.load %arg9[%c0_71, %c0_72] : memref<1x32xf32, #tpu.memory_space<vmem>>, vector<1x32xf32>
    %cst_73 = arith.constant dense<0.000000e+00> : vector<8xf32>
    %131 = vector.multi_reduction <add>, %128, %cst_73 [1] : vector<8x32xf32> to vector<8xf32>
    %132 = vector.shape_cast %131 : vector<8xf32> to vector<8x1xf32>
    %cst_74 = arith.constant 3.200000e+01 : f32
    %133 = vector.broadcast %cst_74 : f32 to vector<8x1xf32>
    %134 = arith.divf %132, %133 : vector<8x1xf32>
    %135 = vector.broadcast %134 : vector<8x1xf32> to vector<8x32xf32>
    %136 = arith.subf %128, %135 : vector<8x32xf32>
    %137 = arith.mulf %136, %136 : vector<8x32xf32>
    %cst_75 = arith.constant dense<0.000000e+00> : vector<8xf32>
    %138 = vector.multi_reduction <add>, %137, %cst_75 [1] : vector<8x32xf32> to vector<8xf32>
    %139 = vector.shape_cast %138 : vector<8xf32> to vector<8x1xf32>
    %cst_76 = arith.constant 3.200000e+01 : f32
    %140 = vector.broadcast %cst_76 : f32 to vector<8x1xf32>
    %141 = arith.divf %139, %140 : vector<8x1xf32>
    %142 = vector.broadcast %134 : vector<8x1xf32> to vector<8x32xf32>
    %143 = arith.subf %128, %142 : vector<8x32xf32>
    %cst_77 = arith.constant 9.99999997E-7 : f32
    %144 = vector.broadcast %cst_77 : f32 to vector<8x1xf32>
    %145 = arith.addf %141, %144 : vector<8x1xf32>
    %146 = math.rsqrt %145 : vector<8x1xf32>
    %147 = vector.broadcast %146 : vector<8x1xf32> to vector<8x32xf32>
    %148 = arith.mulf %143, %147 : vector<8x32xf32>
    %149 = vector.broadcast %129 : vector<1x32xf32> to vector<8x32xf32>
    %150 = arith.mulf %148, %149 : vector<8x32xf32>
    %151 = vector.broadcast %130 : vector<1x32xf32> to vector<8x32xf32>
    %152 = arith.addf %150, %151 : vector<8x32xf32>
    %c0_78 = arith.constant 0 : index
    %c0_79 = arith.constant 0 : index
    %153 = vector.load %arg10[%c0_78, %c0_79] : memref<1x32xf32, #tpu.memory_space<vmem>>, vector<1x32xf32>
    %c0_80 = arith.constant 0 : index
    %c0_81 = arith.constant 0 : index
    %154 = vector.load %arg11[%c0_80, %c0_81] : memref<1x32xf32, #tpu.memory_space<vmem>>, vector<1x32xf32>
    %cst_82 = arith.constant dense<0.000000e+00> : vector<8xf32>
    %155 = vector.multi_reduction <add>, %152, %cst_82 [1] : vector<8x32xf32> to vector<8xf32>
    %156 = vector.shape_cast %155 : vector<8xf32> to vector<8x1xf32>
    %cst_83 = arith.constant 3.200000e+01 : f32
    %157 = vector.broadcast %cst_83 : f32 to vector<8x1xf32>
    %158 = arith.divf %156, %157 : vector<8x1xf32>
    %159 = vector.broadcast %158 : vector<8x1xf32> to vector<8x32xf32>
    %160 = arith.subf %152, %159 : vector<8x32xf32>
    %161 = arith.mulf %160, %160 : vector<8x32xf32>
    %cst_84 = arith.constant dense<0.000000e+00> : vector<8xf32>
    %162 = vector.multi_reduction <add>, %161, %cst_84 [1] : vector<8x32xf32> to vector<8xf32>
    %163 = vector.shape_cast %162 : vector<8xf32> to vector<8x1xf32>
    %cst_85 = arith.constant 3.200000e+01 : f32
    %164 = vector.broadcast %cst_85 : f32 to vector<8x1xf32>
    %165 = arith.divf %163, %164 : vector<8x1xf32>
    %166 = vector.broadcast %158 : vector<8x1xf32> to vector<8x32xf32>
    %167 = arith.subf %152, %166 : vector<8x32xf32>
    %cst_86 = arith.constant 9.99999997E-7 : f32
    %168 = vector.broadcast %cst_86 : f32 to vector<8x1xf32>
    %169 = arith.addf %165, %168 : vector<8x1xf32>
    %170 = math.rsqrt %169 : vector<8x1xf32>
    %171 = vector.broadcast %170 : vector<8x1xf32> to vector<8x32xf32>
    %172 = arith.mulf %167, %171 : vector<8x32xf32>
    %173 = vector.broadcast %153 : vector<1x32xf32> to vector<8x32xf32>
    %174 = arith.mulf %172, %173 : vector<8x32xf32>
    %175 = vector.broadcast %154 : vector<1x32xf32> to vector<8x32xf32>
    %176 = arith.addf %174, %175 : vector<8x32xf32>
    %177 = arith.truncf %176 : vector<8x32xf32> to vector<8x32xbf16>
    %c0_87 = arith.constant 0 : index
    %c0_88 = arith.constant 0 : index
    %178 = vector.load %arg12[%c0_87, %c0_88] : memref<32x64xbf16, #tpu.memory_space<vmem>>, vector<32x64xbf16>
    %cst_89 = arith.constant dense<0.000000e+00> : vector<8x64xf32>
    %179 = tpu.matmul %177, %178, %cst_89 {dimension_numbers = #tpu.dot_dimension_numbers<[1], [0], [0], [1], [0, 0, 1, 1], [], []>} : vector<8x32xbf16>, vector<32x64xbf16>, vector<8x64xf32> -> vector<8x64xf32>
    %c0_90 = arith.constant 0 : index
    %c0_91 = arith.constant 0 : index
    %180 = vector.load %arg13[%c0_90, %c0_91] : memref<1x64xf32, #tpu.memory_space<vmem>>, vector<1x64xf32>
    %181 = vector.broadcast %180 : vector<1x64xf32> to vector<8x64xf32>
    %182 = arith.addf %179, %181 : vector<8x64xf32>
    %cst_92 = arith.constant 0.000000e+00 : f32
    %183 = vector.broadcast %cst_92 : f32 to vector<8x64xf32>
    %184 = arith.maximumf %182, %183 : vector<8x64xf32>
    %185 = arith.truncf %184 : vector<8x64xf32> to vector<8x64xbf16>
    %c0_93 = arith.constant 0 : index
    %c0_94 = arith.constant 0 : index
    %186 = vector.load %arg14[%c0_93, %c0_94] : memref<64x32xbf16, #tpu.memory_space<vmem>>, vector<64x32xbf16>
    %cst_95 = arith.constant dense<0.000000e+00> : vector<8x32xf32>
    %187 = tpu.matmul %185, %186, %cst_95 {dimension_numbers = #tpu.dot_dimension_numbers<[1], [0], [0], [1], [0, 0, 1, 1], [], []>} : vector<8x64xbf16>, vector<64x32xbf16>, vector<8x32xf32> -> vector<8x32xf32>
    %c0_96 = arith.constant 0 : index
    %c0_97 = arith.constant 0 : index
    %188 = vector.load %arg15[%c0_96, %c0_97] : memref<1x32xf32, #tpu.memory_space<vmem>>, vector<1x32xf32>
    %189 = vector.broadcast %188 : vector<1x32xf32> to vector<8x32xf32>
    %190 = arith.addf %187, %189 : vector<8x32xf32>
    %191 = arith.addf %190, %152 : vector<8x32xf32>
    %c0_98 = arith.constant 0 : index
    %c0_99 = arith.constant 0 : index
    %c0_100 = arith.constant 0 : index
    %192 = vector.load %arg16[%c0_98, %c0_99, %c0_100] : memref<1x8x32xf32, #tpu.memory_space<vmem>>, vector<1x8x32xf32>
    %193 = vector.shape_cast %192 : vector<1x8x32xf32> to vector<8x32xf32>
    %194 = vector.shape_cast %191 : vector<8x32xf32> to vector<1x8x32xf32>
    tpu.vector_store %arg16[%c0_98, %c0_99, %c0_100], %194 {strides = array<i32>} : memref<1x8x32xf32, #tpu.memory_space<vmem>>, vector<1x8x32xf32>,
    return
  }
  func.func @transform_0(%arg0: i32, %arg1: i32) -> (i32, i32, i32) {
    %c0_i32 = arith.constant 0 : i32
    %c0_i32_0 = arith.constant 0 : i32
    %c0_i32_1 = arith.constant 0 : i32
    return %arg0, %c0_i32, %c0_i32_0 : i32, i32, i32
  }
  func.func @transform_1(%arg0: i32, %arg1: i32) -> (i32, i32, i32) {
    %c0_i32 = arith.constant 0 : i32
    %c0_i32_0 = arith.constant 0 : i32
    return %arg0, %arg1, %c0_i32 : i32, i32, i32
  }
  func.func @transform_2(%arg0: i32, %arg1: i32) -> (i32, i32) {
    %c0_i32 = arith.constant 0 : i32
    %c0_i32_0 = arith.constant 0 : i32
    %c0_i32_1 = arith.constant 0 : i32
    return %c0_i32, %c0_i32_0 : i32, i32
  }
  func.func @transform_3(%arg0: i32, %arg1: i32) -> (i32, i32) {
    %c0_i32 = arith.constant 0 : i32
    %c0_i32_0 = arith.constant 0 : i32
    %c0_i32_1 = arith.constant 0 : i32
    return %c0_i32, %c0_i32_0 : i32, i32
  }
  func.func @transform_4(%arg0: i32, %arg1: i32) -> (i32, i32, i32) {
    %c0_i32 = arith.constant 0 : i32
    %c0_i32_0 = arith.constant 0 : i32
    %c0_i32_1 = arith.constant 0 : i32
    %c0_i32_2 = arith.constant 0 : i32
    return %c0_i32, %c0_i32_0, %c0_i32_1 : i32, i32, i32
  }
  func.func @transform_5(%arg0: i32, %arg1: i32) -> (i32, i32) {
    %c0_i32 = arith.constant 0 : i32
    %c0_i32_0 = arith.constant 0 : i32
    %c0_i32_1 = arith.constant 0 : i32
    return %c0_i32, %c0_i32_0 : i32, i32
  }
  func.func @transform_6(%arg0: i32, %arg1: i32) -> (i32, i32) {
    %c0_i32 = arith.constant 0 : i32
    %c0_i32_0 = arith.constant 0 : i32
    %c0_i32_1 = arith.constant 0 : i32
    return %c0_i32, %c0_i32_0 : i32, i32
  }
  func.func @transform_7(%arg0: i32, %arg1: i32) -> (i32, i32) {
    %c0_i32 = arith.constant 0 : i32
    %c0_i32_0 = arith.constant 0 : i32
    %c0_i32_1 = arith.constant 0 : i32
    return %c0_i32, %c0_i32_0 : i32, i32
  }
  func.func @transform_8(%arg0: i32, %arg1: i32) -> (i32, i32) {
    %c0_i32 = arith.constant 0 : i32
    %c0_i32_0 = arith.constant 0 : i32
    %c0_i32_1 = arith.constant 0 : i32
    return %c0_i32, %c0_i32_0 : i32, i32
  }
  func.func @transform_9(%arg0: i32, %arg1: i32) -> (i32, i32) {
    %c0_i32 = arith.constant 0 : i32
    %c0_i32_0 = arith.constant 0 : i32
    %c0_i32_1 = arith.constant 0 : i32
    return %c0_i32, %c0_i32_0 : i32, i32
  }
  func.func @transform_10(%arg0: i32, %arg1: i32) -> (i32, i32) {
    %c0_i32 = arith.constant 0 : i32
    %c0_i32_0 = arith.constant 0 : i32
    %c0_i32_1 = arith.constant 0 : i32
    return %c0_i32, %c0_i32_0 : i32, i32
  }
  func.func @transform_11(%arg0: i32, %arg1: i32) -> (i32, i32) {
    %c0_i32 = arith.constant 0 : i32
    %c0_i32_0 = arith.constant 0 : i32
    %c0_i32_1 = arith.constant 0 : i32
    return %c0_i32, %c0_i32_0 : i32, i32
  }
  func.func @transform_12(%arg0: i32, %arg1: i32) -> (i32, i32) {
    %c0_i32 = arith.constant 0 : i32
    %c0_i32_0 = arith.constant 0 : i32
    %c0_i32_1 = arith.constant 0 : i32
    return %c0_i32, %c0_i32_0 : i32, i32
  }
  func.func @transform_13(%arg0: i32, %arg1: i32) -> (i32, i32) {
    %c0_i32 = arith.constant 0 : i32
    %c0_i32_0 = arith.constant 0 : i32
    %c0_i32_1 = arith.constant 0 : i32
    return %c0_i32, %c0_i32_0 : i32, i32
  }
  func.func @transform_14(%arg0: i32, %arg1: i32) -> (i32, i32, i32) {
    %c0_i32 = arith.constant 0 : i32
    %c0_i32_0 = arith.constant 0 : i32
    return %arg0, %arg1, %c0_i32 : i32, i32, i32
  }
  func.func @transform_15(%arg0: i32, %arg1: i32) -> (i32, i32, i32, i32) {
    %c0_i32 = arith.constant 0 : i32
    %c0_i32_0 = arith.constant 0 : i32
    %c0_i32_1 = arith.constant 0 : i32
    return %arg0, %c0_i32, %arg1, %c0_i32_0 : i32, i32, i32, i32
  }
}

</mosaic_0001>

<bundles_post_ra>
// kernel: tpu_custom_call.1
= control target key start
LH: loop header
LB: loop body
LE: loop exit
PB: predicated region body
PF: predicated region fallthrough
CT: control target
= control target key end

     0   :  { %s2277_s0 = inlined_call_operand.vmem [shape: f32[2,16,32], index: 0, kind: input, shape index: {}]   ;;  %s2278_s1 = inlined_call_operand.hbm [shape: s32[2,16,16], index: 1, kind: input, shape index: {}]   ;;  %s2279_s2 = inlined_call_operand.vmem [shape: bf16[32,96], index: 2, kind: input, shape index: {}]   ;;  %s2280_s3 = inlined_call_operand.vmem [shape: f32[1,96], index: 3, kind: input, shape index: {}]   ;;  %s2281_s4 = inlined_call_operand.hbm [shape: bf16[4,8,32], index: 4, kind: input, shape index: {}]   ;;  %s2282_s5 = inlined_call_operand.vmem [shape: f32[1,32], index: 5, kind: input, shape index: {}]   ;;  %s2283_s6 = inlined_call_operand.vmem [shape: f32[1,32], index: 6, kind: input, shape index: {}]   ;;  %s2284_s7 = inlined_call_operand.vmem [shape: f32[1,32], index: 7, kind: input, shape index: {}]   ;;  %s2285_s8 = inlined_call_operand.vmem [shape: f32[1,32], index: 8, kind: input, shape index: {}]   ;;  %s2286_s9 = inlined_call_operand.vmem [shape: f32[1,32], index: 9, kind: input, shape index: {}]   ;;  %s2287_s10 = inlined_call_operand.hbm [shape: bf16[32,64], index: 10, kind: input, shape index: {}]   ;;  %s2288_s11 = inlined_call_operand.vmem [shape: f32[1,64], index: 11, kind: input, shape index: {}]   ;;  %s2289_s12 = inlined_call_operand.vmem [shape: bf16[64,32], index: 12, kind: input, shape index: {}]   ;;  %s2290_s13 = inlined_call_operand.vmem [shape: f32[1,32], index: 13, kind: input, shape index: {}]   ;;  %s2291_s14 = inlined_call_operand.hbm [shape: f32[2,16,32], index: 14, kind: output, shape index: {0}]   ;;  %s2292_s15 = inlined_call_operand.hbm [shape: f32[2,4,16,16], index: 15, kind: output, shape index: {1}]  }
   0x1   :  { %2303 = sst [smem:[#allocation20_spill]] %s2277_s0 }
   0x2   :  { %2304 = sst [smem:[#allocation21_spill]] %s2278_s1 }
   0x3   :  { %2305 = sst [smem:[#allocation22_spill]] %s2279_s2 }
   0x4   :  { %2306 = sst [smem:[#allocation23_spill]] %s2280_s3 }
   0x5   :  { %2307 = sst [smem:[#allocation24_spill]] %s2281_s4 }
   0x6   :  { %2308 = sst [smem:[#allocation25_spill]] %s2282_s5 }
   0x7   :  { %2309 = sst [smem:[#allocation26_spill]] %s2283_s6 }
   0x8   :  { %2310 = sst [smem:[#allocation27_spill]] %s2284_s7 }
   0x9   :  { %2311 = sst [smem:[#allocation28_spill]] %s2285_s8 }
   0xa   :  { %2312 = sst [smem:[#allocation29_spill]] %s2286_s9 }
   0xb   :  { %2313 = sst [smem:[#allocation30_spill]] %s2287_s10 }
   0xc   :  { %2314 = sst [smem:[#allocation31_spill]] %s2288_s11 }
   0xd   :  { %2315 = sst [smem:[#allocation32_spill]] %s2289_s12 }
   0xe   :  { %2316 = sst [smem:[#allocation33_spill]] %s2290_s13 }
   0xf   :  { %2317 = sst [smem:[#allocation34_spill]] %s2291_s14 }
  0x10   :  { %2318 = sst [smem:[#allocation35_spill]] %s2292_s15 }
  0x11   :  { %21 = vsyncpa [#allocation4], 0 }
  0x12   :  { %23 = vsyncpa [#allocation4 + $0x1], 0 }
  0x13   :  { %24 = vsyncpa [#allocation7], 0 }
  0x14   :  { %25 = vsyncpa [#allocation5], 0 }
  0x15   :  { %27 = vsyncpa [#allocation5 + $0x1], 0 }
  0x16   :  { %28 = vsyncpa [#allocation11], 0 }
  0x17   :  { %30 = vsyncpa [#allocation11 + $0x1], 0  ;;  %s1956_s18 = smov 0   ;;  %s1958_s19 = smov 0  }
  0x18   :  { %s1960_s20 = smov 0   ;;  %s1962_s21 = smov 0  }
  0x19   :  { %s1964_s22 = smov 0   ;;  %s1966_s23 = smov 0  }
  0x1a   :  { %s1968_s24 = smov 0   ;;  %s1970_s25 = smov 0  }
  0x1b LB: > { %2319 = sst [smem:[#allocation16_spill]] %s1827_s18  ;;  %s2293_s26 = sadd.s32 4294967295, %s1855_s25   ;;  %s1855_s25 = sphi %s1970_s25, %s36_s25   ;;  %s1851_s24 = sphi %s1968_s24, %s2357_s24   ;;  %s1847_s23 = sphi %s1966_s23, %s2356_s23   ;;  %s1843_s22 = sphi %s1964_s22, %s2355_s22   ;;  %s1839_s21 = sphi %s1962_s21, %s2354_s21   ;;  %s1835_s20 = sphi %s1960_s20, %s2353_s20   ;;  %s1831_s19 = sphi %s1958_s19, %s2352_s19   ;;  %s1827_s18 = sphi %s1956_s18, %s2351_s18  }
  0x1c   : > { %p1375_p0 = scmp.ge.s32.totalorder %s1855_s25, 1  ;;  %p2000_p1 = scmp.eq.s32.totalorder %s2293_s26, 0 }
  0x1d   : > { %p415_p2 = scmp.lt.s32.totalorder %s1855_s25, 5  ;;  %s2321_s4 = sld [smem:[#allocation24_spill]] }
  0x1e   : > { %s1857_s17 = smov [#allocation6]   ;;  %s2323_s10 = sld [smem:[#allocation30_spill]] }
  0x1f   : > { %p2008_p3 = pnand %p1375_p0, %p415_p2  ;;  %s434_s26 = sshll.u32 %s1857_s17, 4  ;;  %s435_s26 = int_to_ptr.vmem [resolvable:$true] %s434_s26 }
  0x20   : > { %s1858_s14 = smov 64   ;;  %s1859_s13 = smov 4  }
  0x21   : > { %p1494_p4 = pneg %p2008_p3  ;;  %s1860_s17 = smov [#allocation8]  }
  0x22   : > { %s463_s15 = sshll.u32 %s1860_s17, 4  ;;  %s1374_s11 = sadd.s32 4294967294, %s1855_s25   ;;  %s464_s15 = int_to_ptr.vmem [resolvable:$true] %s463_s15 }
  0x23   : > { %s432_s30 = sshll.u32 %s2321_s4, 4  ;;  %p1495_p5 = pnand %p1494_p4, %p2000_p1  ;;  %s433_s30 = int_to_ptr.hbm [resolvable:$true] %s432_s30 }
  0x24   : > { %s461_s4 = sshll.u32 %s2323_s10, 4  ;;  %s45_s9 = sadd.s32 1, %s1847_s23  ;;  %s462_s4 = int_to_ptr.hbm [resolvable:$true] %s461_s4 }
  0x25   : > { %1497 = dma.hbm_to_vmem [thread:$0]  (!%p1495_p5), %s433_s30, 256, %s435_s26, [#allocation7], %s1858_s14, %s1858_s14, %s1859_s13  }
  0x26   : > { %1500 = dma.hbm_to_vmem [thread:$0]  (!%p1495_p5), %s462_s4, 256, %s464_s15, [#allocation7], %s1858_s14, %s1858_s14, %s1859_s13  }
  0x27   : > { %p46_p6 = scmp.ge.s32.totalorder %s45_s9, 2  ;;  %s48_s28 = sadd.s32 1, %s1851_s24 }
  0x28   : > { %s83_s29 = sadd.s32 1, %s1835_s20  ;;  %p90_p7 = scmp.ne.s32.totalorder %s1835_s20, %s1831_s19 }
  0x29   : > { %s2359_s9 = smov (%p46_p6, %s45_s9), 0  ;;  %s2361_s28 = smov (!%p46_p6, %s48_s28), %s1851_s24 }
  0x2a   : > { %2324 = sst [smem:[#allocation17_spill]] %s2359_s9  ;;  %s79_s26 = ssub.s32 %s1847_s23, %s2359_s9 }
  0x2b   : > { %p91_p8 = scmp.eq.s32.totalorder %s1855_s25, 0  ;;  %p50_p9 = scmp.ge.s32.totalorder %s2361_s28, 2 }
  0x2c   : > { %p96_p10 = scmp.ne.s32.totalorder %s1831_s19, %s1827_s18  ;;  %s2326_s13 = sadd.s32 4294967295, %s1855_s25  }
  0x2d   : > { %p2033_p11 = por %p91_p8, %p90_p7  ;;  %p374_p12 = scmp.eq.s32.totalorder %s2326_s13, 3 }
  0x2e   : > { %s2363_s28 = smov (%p50_p9, %s2361_s28), 0  ;;  %p2043_p13 = por %p2000_p1, %p96_p10 }
  0x2f   : > { %2327 = sst [smem:[#allocation18_spill]] %s2363_s28  ;;  %p2047_p0 = por %p374_p12, %p90_p7 }
  0x30   : > { %s78_s30 = ssub.s32 %s1851_s24, %s2363_s28  ;;  %p380_p2 = scmp.eq.s32.totalorder %s1374_s11, 3 }
  0x31   : > { %s2329_s15 = scalar_select %p2047_p0, 1, 0 }
  0x32   : > { %s80_s17 = sor.u32 %s79_s26, %s78_s30  ;;  %p1514_p4 = scmp.lt.s32.totalorder %s1855_s25, 4 }
  0x33   : > { %2330 = sst [smem:[#allocation19_spill]] %s2329_s15  ;;  %p81_p5 = scmp.eq.s32.totalorder %s80_s17, 0 }
  0x34   : > { %p2054_p6 = por %p380_p2, %p96_p10  ;;  %s494_s10 = sand.u32 1, %s1835_s20  }
  0x35   : > { %s1380_s9 = sshll.u32 %s1851_s24, 1  ;;  %s1379_s8 = sshll.u32 %s494_s10, 3 }
  0x36   : > { %s2061_s18 = scalar_select %p81_p5, %s1835_s20, %s83_s29  }
  0x37   : > { %s502_s12 = sadd.s32 %s1847_s23, %s1380_s9  ;;  %s498_s6 = scalar_lea.vmem [#allocation3], %s1379_s8 }
  0x38   : > { %s1381_s7 = sshll.u32 %s502_s12, 3  ;;  %s508_s15 = sshll.u32 %s498_s6, 4  ;;  %s509_s15 = int_to_ptr.vmem [resolvable:$true] %s508_s15 }
  0x39   : > { %s2332_s1 = sld [smem:[#allocation21_spill]]  ;;  %p1502_p7 = pnand %p1514_p4, %p2033_p11 }
  0x3a   : > { %s495_s30 = scalar_lea.sflag [#allocation4], %s494_s10  ;;  %s2074_s9 = sand.u32 (!%p2008_p3), 1, %s1831_s19  }
  0x3b   : > { %s1383_s6 = sshll.u32 (!%p2008_p3), %s2074_s9, 3  ;;  %s520_s8 = scalar_lea.sflag (!%p2008_p3), [#allocation4], %s2074_s9 }
  0x3d   : > { %517 = sbr.rel (%p2008_p3) target bundleno = 2364 (0x93c), region = 76 }
  0x3f   : > { %s504_s5 = scalar_lea.hbm %s2332_s1, %s1381_s7  ;;  %s2078_s7 = scalar_lea.vmem (!%p2008_p3), [#allocation3], %s1383_s6 }
  0x40   : > { %s506_s26 = sshll.u32 %s504_s5, 4  ;;  %s507_s26 = int_to_ptr.hbm [resolvable:$true] %s506_s26 }
  0x41   : > { %1504 = dma.hbm_to_vmem [thread:$0]  (!%p1502_p7), %s507_s26, 128, %s509_s15, %s495_s30  }
  0x42   : > { %1810 = dma.done.wait (%p2043_p13), %s520_s8, 128  }
  0x43   : > { %1812 = vsyncadd (%p2043_p13), %s520_s8, 4294967168 }
  0x44   : > { %1814 = dma.done.wait (%p2000_p1), [#allocation7], 512  }
  0x45   : > { %1816 = vsyncadd (%p2000_p1), [#allocation7], 4294966784  ;;  %s1387_s5 = sshll.u32 %s2074_s9, 5  ;;  %p591_p3 = scmp.lt.s32.totalorder %s1843_s22, 1 }
  0x46   : > { %s2333_s0 = sld [smem:[#allocation20_spill]]  ;;  %s2096_s4 = scalar_lea.vmem [#allocation9], %s1383_s6 }
  0x47   : > { %s592_s10 = scalar_select %p591_p3, %s1843_s22, 1 }
  0x48   : > { %s2098_s14 = scalar_lea.vmem [#allocation10], %s1387_s5  ;;  %p1390_p8 = scmp.ne.s32.totalorder %s1839_s21, 0 }
  0x49   : > { %s1467_s12 = sshll.u32 %s592_s10, 4  ;;  %s2334_s2 = sld [smem:[#allocation22_spill]] (!%p1390_p8) }
  0x4a   : > { %600 = sbr.rel (%p1390_p8) target bundleno = 226 (0xe2), region = 92  ;;  %s2335_s3 = sld [smem:[#allocation23_spill]] (!%p1390_p8) }
  0x4c   : > { %s2094_s29 = scalar_lea.vmem %s2333_s0, %s1467_s12 }
  0x4f   : > { %v1469_v0 = vld [vmem:[%s2334_s2 + $0x8] sm:$0xff]  ;;  %v1468_v1 = vld [vmem:[%s2334_s2] sm:$0xff]  ;;  %vm624_vm0 = vcmask 261120   ;;  %vm644_vm1 = vcmask 781312  }
  0x50   : > { %634 = vmatpush.bf16.msra.mxu0 %v1469_v0  ;;  %v601_v2 = vld [vmem:[%s2094_s29] sm:$0xff]  ;;  %v602_v3 = vld [vmem:[%s2094_s29 + $0x8] sm:$0xff] }
  0x51   : > { %v603_v4 = vpack.c.bf16 %v602_v3, %v601_v2  ;;  %v1601_v5 = vld [vmem:[%s2335_s3] ss:$0 sm:$0xff] }
  0x54   : > { %635 = vmatpush.bf16.msra.mxu0 %v1468_v1 }
  0x57   : > { %1399 = vmatmul.msk.bf16.vlgmr.msra.gmra.mxu0 %vm624_vm0, %v603_v4 }
  0xd4   : > { %v637_v6 = vpop.f32.mrf.mxu0 }
  0xd5   : > { %v638_v7 = vadd.f32 %v1601_v5, %v637_v6 }
  0xd7   : > { %v642_v8 = vpack.c.bf16 %v638_v7, %v638_v7 }
  0xd9   : > { %645 = vst.msk [vmem:[#allocation2] sm:$0xf] %vm644_vm1, %v642_v8 }
  0xdc   : > { %v639_v9 = vpop.f32.mrf.mxu0 }
  0xdd   : > { %v640_v10 = vadd.f32 %v1601_v5, %v639_v9 }
  0xdf   : > { %v643_v11 = vpack.c.bf16 %v640_v10, %v640_v10 }
  0xe1   : > { %646 = vst.msk [vmem:[#allocation2 + $0x4] sm:$0xf] %vm644_vm1, %v643_v11 }
  0xe2 PF: > { %s1400_s6 = sshll.u32 %s1839_s21, 3  ;;  %s1861_s8 = smov 96   ;;  %vm665_vm2 = vcmask 64512   ;;  %v2120_v22 = vld [vmem:[%s2078_s7] sm:$0xff]  ;;  %vm687_vm4 = vcmask 130048   ;;  %vm795_vm5 = vcmask 1043456  }
  0xe3   : > { %s650_s5 = sshra.s32 %s1400_s6, 3  ;;  %s1862_s16 = smov 88   ;;  %vm685_vm3 = vcmp.ne.s32.totalorder %v2120_v22, 0  ;;  %v721_v58 = vld [vmem:[#allocation6] sm:$0xf]  ;;  %vm1013_vm6 = vcmask 261120  }
  0xe4   : > { %s1401_s10 = sshll.u32 %s650_s5, 2  ;;  %s1863_s28 = smov 120   ;;  %v816_v59 = vsel %vm795_vm5, %v721_v58, 0  ;;  %v791_v0 = vld [vmem:[#allocation6 + $0x4] sm:$0xf]  ;;  %vm1158_vm14 = vcmask 523264  }
  0xe5   : > { %s653_s12 = scalar_lea.vmem [#allocation2], %s1401_s10  ;;  %s1864_s7 = smov 56   ;;  %v797_v1 = vsel %vm795_vm5, %v791_v0, 0 }
  0xe6   : > { %s1865_s27 = smov 104   ;;  %s1866_s15 = smov 64  }
  0xe7   : > { %s1867_s17 = smov 72   ;;  %s1868_s11 = smov 112  }
  0xe8   : > { %v1470_v12 = vld [vmem:[#allocation2] sm:$0xff]  ;;  %s1869_s26 = smov 80   ;;  %s1870_s30 = smov 48  }
  0xe9   : > { %663 = vrot.lane.b32.xlu0 %v1470_v12, %s1861_s8  ;;  %v654_v13 = vld [vmem:[%s653_s12] sm:$0xf]  ;;  %s1871_s8 = smov 40   ;;  %s2336_s12 = sld [smem:[#allocation25_spill]] }
  0xea   : > { %v1471_v14 = vld [vmem:[#allocation2] sm:$0xff]  ;;  %v725_v15 = vunpack.c.l.b16 %v654_v13  ;;  %s1463_s5 = sshll.u32 %s1843_s22, 3 }
  0xeb   : > { %v2130_v36 = vld [vmem:[#allocation2] sm:$0xff]  ;;  %s1209_s10 = sadd.s32 %s1839_s21, %s1463_s5 }
  0xec   : > { %v726_v16 = vpack.c.b16 %v725_v15, %v725_v15  ;;  %v1472_v42 = vld [vmem:[#allocation2] sm:$0xff] }
  0xee   : > { %727 = vrot.lane.b32.xlu1 %v726_v16, %s1863_s28  ;;  %s2337_s28 = sld [smem:[#allocation26_spill]] }
  0xf1   : > { %734 = vrot.lane.b32.xlu0 %v1471_v14, %s1862_s16  ;;  %s648_s16 = scalar_lea.vmem %s2094_s29, %s1400_s6  ;;  %s2341_s6 = sld [smem:[#allocation29_spill]] }
 0x15b   : > { %v664_v17 = vpop.permute.xlu0 %663 }
 0x15c   : > { %v670_v18 = vsel %vm665_vm2, %v664_v17, 0 }
 0x15d   : > { %679 = vmatpush.bf16.xpose.msra.mxu0 %v670_v18 }
 0x160   : > { %v728_v21 = vpop.permute.xlu1 %727 }
 0x163   : > { %v735_v19 = vpop.permute.xlu0 %734 }
 0x164   : > { %1406 = vmatmul.msk.bf16.vlgmr.msra.gmra.mxu0 %vm665_vm2, %v654_v13  ;;  %v740_v20 = vsel %vm665_vm2, %v735_v19, 0 }
 0x165   : > { %749 = vmatpush.bf16.xpose.msra.mxu2 %v740_v20 }
 0x16c   : > { %1412 = vmatmul.msk.bf16.vlgmr.msra.gmra.mxu2 %vm665_vm2, %v728_v21 }
 0x1e1   : > { %v681_v23 = vpop.f32.mrf.mxu0 }
 0x1e2   : > { %v686_v24 = vsel %vm685_vm3, -1e+18, %v681_v23 }
 0x1e3   : > { %v688_v25 = vsel %vm687_vm4, %v686_v24, -inf }
 0x1e4   : > { %689 = vmax.xlane.f32.xlu1 %v688_v25 }
 0x1e9   : > { %v683_v26 = vpop.f32.mrf.mxu0 }
 0x1ef   : > { %v751_v27 = vpop.f32.mrf.mxu2 }
 0x1f0   : > { %v755_v28 = vsel %vm685_vm3, -1e+18, %v751_v27 }
 0x1f1   : > { %v756_v29 = vsel %vm687_vm4, %v755_v28, -inf }
 0x1f2   : > { %757 = vmax.xlane.f32.xlu0 %v756_v29 }
 0x1f7   : > { %v753_v30 = vpop.f32.mrf.mxu2 }
 0x1fd   : > { %770 = vrot.lane.b32.xlu1 %v1471_v14, %s1864_s7  ;;  %s1212_s7 = sshll.u32 %s2098_s14, 4  ;;  %s1213_s7 = int_to_ptr.vmem [resolvable:$true] %s1212_s7 }
 0x205   : > { %920 = vrot.lane.b32.xlu1 %v726_v16, %s1865_s27 }
 0x206   : > { %927 = vrot.lane.b32.xlu0 %v2130_v36, %s1867_s17 }
 0x20e   : > { %833 = vrot.lane.b32.xlu0 %v726_v16, %s1868_s11 }
 0x257   : > { %v690_v31 = vpop.xlane.xlu1 %689 }
 0x258   : > { %v691_v32 = vsub.f32 %v686_v24, %v690_v31 }
 0x25a   : > { %v692_v33 = vmul.f32 1.442695, %v691_v32 }
 0x25c   : > { %1609 = vpow2.f32 %v692_v33 }
 0x262   : > { %v1610_v34 = vpop.eup %1609 }
 0x263   : > { %v694_v35 = vsel %vm687_vm4, %v1610_v34, 0.0 }
 0x264   : > { %695 = vadd.xlane.f32.xlu2 %v694_v35 }
 0x265   : > { %v758_v37 = vpop.xlane.xlu0 %757 }
 0x266   : > { %v759_v38 = vsub.f32 %v755_v28, %v758_v37 }
 0x268   : > { %v760_v39 = vmul.f32 1.442695, %v759_v38 }
 0x26a   : > { %1611 = vpow2.f32 %v760_v39 }
 0x26f   : > { %v771_v48 = vpop.permute.xlu1 %770 }
 0x270   : > { %v1612_v40 = vpop.eup %1611  ;;  %783 = vmatpush.bf16.msra.mxu3 %v771_v48 }
 0x271   : > { %v762_v41 = vsel %vm687_vm4, %v1612_v40, 0.0 }
 0x274   : > { %825 = vmatpush.bf16.msrb.mxu3 %v816_v59  ;;  %v1872_v59 = vmov 32.0  }
 0x277   : > { %v921_v63 = vpop.permute.xlu1 %920 }
 0x278   : > { %v928_v50 = vpop.permute.xlu0 %927 }
 0x279   : > { %v933_v57 = vsel %vm665_vm2, %v928_v50, 0 }
 0x27c   : > { %701 = vrot.lane.b32.xlu2 %v1470_v12, %s1866_s15  ;;  %s2338_s15 = sld [smem:[#allocation27_spill]] }
 0x280   : > { %v834_v56 = vpop.permute.xlu0 %833 }
 0x2a5   : > { %763 = vadd.xlane.f32.xlu2 %v762_v41 }
 0x2bd   : > { %840 = vrot.lane.b32.xlu2 %v1472_v42, %s1869_s26  ;;  %s2339_s26 = sld [smem:[#allocation32_spill]] }
 0x2d7   : > { %v696_v43 = vpop.xlane.xlu2 %695 }
 0x2d8   : > { %1613 = vrcp.f32 %v696_v43  ;;  %v984_v43 = vld [vmem:[#allocation6 + $0xc] sm:$0xf] }
 0x2de   : > { %v1614_v44 = vpop.eup %1613 }
 0x2df   : > { %v702_v45 = vpop.permute.xlu2 %701  ;;  %v698_v46 = vmul.f32 %v1614_v44, %v1610_v34  ;;  %v989_v44 = vsel %vm795_vm5, %v984_v43, 0 }
 0x2e0   : > { %714 = vmatpush.bf16.msra.mxu1 %v702_v45 }
 0x2e1   : > { %699 = vst.msk [vmem:[%s2098_s14] sm:$0xff] %vm687_vm4, %v698_v46  ;;  %v700_v47 = vpack.c.bf16 %v698_v46, %v698_v46 }
 0x2e3   : > { %1407 = vmatmul.msk.bf16.vlgmr.msra.gmra.mxu1 %vm687_vm4, %v700_v47 }
 0x2e4   : > { %806 = vmatpush.bf16.msrb.mxu1 %v797_v1 }
 0x318   : > { %v764_v49 = vpop.xlane.xlu2 %763 }
 0x319   : > { %1615 = vrcp.f32 %v764_v49 }
 0x31f   : > { %v1616_v51 = vpop.eup %1615 }
 0x320   : > { %v841_v52 = vpop.permute.xlu2 %840  ;;  %v766_v53 = vmul.f32 %v1616_v51, %v1612_v40  ;;  %v1602_v51 = vld [vmem:[%s2336_s12] ss:$0 sm:$0xff]  ;;  %s2340_s12 = sld [smem:[#allocation28_spill]] }
 0x321   : > { %v846_v54 = vsel %vm665_vm2, %v841_v52, 0 }
 0x322   : > { %855 = vmatpush.bf16.xpose.msrb.mxu0 %v846_v54  ;;  %1413 = vst.msk [vmem:[%s2098_s14 + $0x8] sm:$0xff] %vm687_vm4, %v766_v53  ;;  %v769_v55 = vpack.c.bf16 %v766_v53, %v766_v53  ;;  %v649_v54 = vld [vmem:[%s648_s16] sm:$0xff] }
 0x324   : > { %1414 = vmatmul.msk.bf16.vlgmr.msra.gmra.mxu3 %vm687_vm4, %v769_v55 }
 0x325   : > { %942 = vmatpush.bf16.xpose.msra.mxu3 %v933_v57 }
 0x329   : > { %1421 = vmatmul.msk.bf16.vlgmr.msrb.gmra.mxu0 %vm665_vm2, %v834_v56 }
 0x360   : > { %v716_v60 = vpop.f32.mrf.mxu1 }
 0x361   : > { %v720_v61 = vpack.c.bf16 %v716_v60, %v716_v60 }
 0x363   : > { %1416 = vmatmul.msk.bf16.vlgmr.msrb.gmra.mxu3 %vm665_vm2, %v720_v61 }
 0x368   : > { %v718_v62 = vpop.f32.mrf.mxu1 }
 0x373   : > { %1429 = vmatmul.msk.bf16.vlgmr.msra.gmra.mxu3 %vm665_vm2, %v921_v63 }
 0x3a6   : > { %v857_v2 = vpop.f32.mrf.mxu0 }
 0x3a7   : > { %v861_v3 = vsel %vm685_vm3, -1e+18, %v857_v2  ;;  %v785_v4 = vpop.f32.mrf.mxu3 }
 0x3a8   : > { %v789_v5 = vpack.c.bf16 %v785_v4, %v785_v4  ;;  %v862_v6 = vsel %vm687_vm4, %v861_v3, -inf }
 0x3a9   : > { %863 = vmax.xlane.f32.xlu1 %v862_v6 }
 0x3aa   : > { %1415 = vmatmul.msk.bf16.vlgmr.msrb.gmra.mxu1 %vm665_vm2, %v789_v5 }
 0x3ae   : > { %v859_v7 = vpop.f32.mrf.mxu0 }
 0x3af   : > { %v787_v8 = vpop.f32.mrf.mxu3 }
 0x3e6   : > { %v827_v9 = vpop.f32.mrf.mxu3 }
 0x3ee   : > { %v829_v10 = vpop.f32.mrf.mxu3 }
 0x3f6   : > { %v944_v11 = vpop.f32.mrf.mxu3 }
 0x3f7   : > { %v948_v12 = vsel %vm685_vm3, -1e+18, %v944_v11 }
 0x3f8   : > { %v949_v13 = vsel %vm687_vm4, %v948_v12, -inf }
 0x3f9   : > { %950 = vmax.xlane.f32.xlu0 %v949_v13 }
 0x3fe   : > { %v946_v14 = vpop.f32.mrf.mxu3 }
 0x40d   : > { %876 = vrot.lane.b32.xlu0 %v1472_v42, %s1870_s30  ;;  %s2342_s30 = sld [smem:[#allocation31_spill]] }
 0x41c   : > { %v864_v15 = vpop.xlane.xlu1 %863 }
 0x41d   : > { %v865_v16 = vsub.f32 %v861_v3, %v864_v15 }
 0x41f   : > { %v866_v17 = vmul.f32 1.442695, %v865_v16  ;;  %v1603_v16 = vld [vmem:[%s2337_s28] ss:$0 sm:$0xff] }
 0x421   : > { %1617 = vpow2.f32 %v866_v17 }
 0x427   : > { %v1618_v18 = vpop.eup %1617  ;;  %v808_v19 = vpop.f32.mrf.mxu1 }
 0x428   : > { %v828_v20 = vadd.f32 %v827_v9, %v808_v19  ;;  %v868_v21 = vsel %vm687_vm4, %v1618_v18, 0.0  ;;  %v1604_v19 = vld [vmem:[%s2338_s15] ss:$0 sm:$0xff]  ;;  %s1183_s15 = scalar_lea.sflag [#allocation11], %s2074_s9 }
 0x429   : > { %869 = vadd.xlane.f32.xlu2 %v868_v21 }
 0x42f   : > { %v810_v23 = vpop.f32.mrf.mxu1 }
 0x46c   : > { %v951_v22 = vpop.xlane.xlu0 %950 }
 0x46d   : > { %v952_v24 = vsub.f32 %v948_v12, %v951_v22 }
 0x46f   : > { %v953_v25 = vmul.f32 1.442695, %v952_v24 }
 0x471   : > { %1619 = vpow2.f32 %v953_v25 }
 0x477   : > { %v1620_v26 = vpop.eup %1619 }
 0x478   : > { %v955_v27 = vsel %vm687_vm4, %v1620_v26, 0.0 }
 0x479   : > { %956 = vadd.xlane.f32.xlu1 %v955_v27 }
 0x47f   : > { %v877_v28 = vpop.permute.xlu0 %876 }
 0x480   : > { %889 = vmatpush.bf16.msrb.mxu2 %v877_v28  ;;  %v1475_v28 = vld [vmem:[#allocation8 + $0x8] sm:$0xff] }
 0x484   : > { %998 = vmatpush.bf16.msra.mxu2 %v989_v44  ;;  %v1606_v44 = vld [vmem:[%s2341_s6] ss:$0 sm:$0xff]  ;;  %s2344_s6 = sld [smem:[#allocation35_spill]] }
 0x48a   : > { %s1741_s5 = scalar_lea.hbm %s2344_s6, 128 }
 0x492   : > { %963 = vrot.lane.b32.xlu1 %v2130_v36, %s1871_s8  ;;  %v897_v36 = vld [vmem:[#allocation6 + $0x8] sm:$0xf] }
 0x493   : > { %v902_v39 = vsel %vm795_vm5, %v897_v36, 0 }
 0x494   : > { %911 = vmatpush.bf16.msra.mxu1 %v902_v39 }
 0x498   : > { %1113 = vmatpush.bf16.msrb.mxu1 %v1475_v28 }
 0x49c   : > { %v870_v29 = vpop.xlane.xlu2 %869 }
 0x49d   : > { %1621 = vrcp.f32 %v870_v29  ;;  %v1474_v29 = vld [vmem:[#allocation8] sm:$0xff] }
 0x49e   : > { %1114 = vmatpush.bf16.msrb.mxu1 %v1474_v29 }
 0x4a3   : > { %v1622_v30 = vpop.eup %1621 }
 0x4a4   : > { %v872_v31 = vmul.f32 %v1622_v30, %v1618_v18  ;;  %v1479_v30 = vld [vmem:[%s2339_s26 + $0x18] sm:$0xff] }
 0x4a5   : > { %1166 = vmatpush.bf16.msrb.mxu3 %v1479_v30 }
 0x4a6   : > { %1422 = vst.msk [vmem:[%s2098_s14 + $0x10] sm:$0xff] %vm687_vm4, %v872_v31  ;;  %v875_v32 = vpack.c.bf16 %v872_v31, %v872_v31 }
 0x4a8   : > { %1423 = vmatmul.msk.bf16.vlgmr.msrb.gmra.mxu2 %vm687_vm4, %v875_v32 }
 0x4ec   : > { %v957_v33 = vpop.xlane.xlu1 %956 }
 0x4ed   : > { %1623 = vrcp.f32 %v957_v33  ;;  %v1478_v33 = vld [vmem:[%s2339_s26 + $0x10] sm:$0xff] }
 0x4ee   : > { %1625 = vrcp.f32 %v1872_v59  ;;  %1167 = vmatpush.bf16.msrb.mxu3 %v1478_v33 }
 0x4f3   : > { %v1624_v34 = vpop.eup %1623 }
 0x4f4   : > { %v959_v35 = vmul.f32 %v1624_v34, %v1620_v26  ;;  %v1626_v60 = vpop.eup %1625 }
 0x4f5   : > { %v1018_v61 = vmul.f32 32.0, %v1626_v60  ;;  %vm1022_vm7 = vweird.f32 %v1626_v60 }
 0x4f6   : > { %1430 = vst.msk [vmem:[%s2098_s14 + $0x18] sm:$0xff] %vm687_vm4, %v959_v35  ;;  %v962_v38 = vpack.c.bf16 %v959_v35, %v959_v35 }
 0x4f7   : > { %v1019_v62 = vsub.f32 1.0, %v1018_v61 }
 0x4f9   : > { %v1020_v63 = vmul.f32 %v1626_v60, %v1019_v62 }
 0x4fb   : > { %v1021_v0 = vadd.f32 %v1626_v60, %v1020_v63 }
 0x4fd   : > { %v1023_v1 = vsel %vm1022_vm7, %v1626_v60, %v1021_v0 }
 0x504   : > { %v964_v37 = vpop.permute.xlu1 %963 }
 0x505   : > { %976 = vmatpush.bf16.msra.mxu0 %v964_v37 }
 0x508   : > { %1431 = vmatmul.msk.bf16.vlgmr.msra.gmra.mxu0 %vm687_vm4, %v962_v38 }
 0x52b   : > { %v891_v40 = vpop.f32.mrf.mxu2 }
 0x52c   : > { %v895_v41 = vpack.c.bf16 %v891_v40, %v891_v40 }
 0x52e   : > { %1424 = vmatmul.msk.bf16.vlgmr.msra.gmra.mxu1 %vm665_vm2, %v895_v41  ;;  %v1605_v41 = vld [vmem:[%s2340_s12] ss:$0 sm:$0xff]  ;;  %s1464_s12 = sshll.u32 %s1209_s10, 3 }
 0x52f   : > { %s1211_s28 = scalar_lea.hbm %s2344_s6, %s1464_s12 }
 0x530   : > { %s1214_s27 = sshll.u32 %s1211_s28, 4  ;;  %s1215_s27 = int_to_ptr.hbm [resolvable:$true] %s1214_s27 }
 0x531   : > { %s1735_s17 = sshra.s32 %s1215_s27, 4  ;;  %s1736_s17 = int_to_ptr.hbm [resolvable:$true] %s1735_s17 }
 0x532   : > { %s1737_s11 = scalar_lea.hbm %s1736_s17, 32  ;;  %p1742_p11 = scmp.lt.s32.totalorder %s1736_s17, %s2344_s6 }
 0x533   : > { %v893_v42 = vpop.f32.mrf.mxu2  ;;  %p1738_p1 = scmp.ne.s32.totalorder %s1736_s17, %s1737_s11  ;;  %p1743_p12 = scmp.lt.s32.totalorder %s1741_s5, %s1737_s11 }
 0x535   : > { %p1739_p9 = pnand %p1738_p1, %p2047_p0  ;;  %p1744_p13 = por %p1743_p12, %p1742_p11 }
 0x537   : > { %p1740_p10 = pneg %p1739_p9 }
 0x539   : > { %p1745_p2 = pnand %p1744_p13, %p1740_p10 }
 0x585   : > { %v978_v45 = vpop.f32.mrf.mxu0 }
 0x586   : > { %v982_v46 = vpack.c.bf16 %v978_v45, %v978_v45 }
 0x588   : > { %1432 = vmatmul.msk.bf16.vlgmr.msra.gmra.mxu2 %vm665_vm2, %v982_v46 }
 0x58d   : > { %v980_v47 = vpop.f32.mrf.mxu0 }
 0x5ab   : > { %v913_v48 = vpop.f32.mrf.mxu1 }
 0x5ac   : > { %v917_v49 = vadd.f32 %v913_v48, %v828_v20  ;;  %v1477_v48 = vld [vmem:[%s2339_s26 + $0x8] sm:$0xff] }
 0x5ad   : > { %1168 = vmatpush.bf16.msrb.mxu3 %v1477_v48 }
 0x5b3   : > { %v915_v50 = vpop.f32.mrf.mxu1 }
 0x5b4   : > { %v1607_v50 = vld [vmem:[%s2342_s30] ss:$0 sm:$0xff] }
 0x60b   : > { %v1000_v52 = vpop.f32.mrf.mxu2 }
 0x60c   : > { %v1004_v53 = vadd.f32 %v1000_v52, %v917_v49  ;;  %v1476_v49 = vld [vmem:[%s2339_s26] sm:$0xff] }
 0x60d   : > { %1169 = vmatpush.bf16.msrb.mxu3 %v1476_v49 }
 0x60e   : > { %v1009_v55 = vadd.f32 %v1602_v51, %v1004_v53 }
 0x610   : > { %v1010_v56 = vadd.f32 %v1009_v55, %v649_v54 }
 0x612   : > { %v1014_v57 = vsel %vm1013_vm6, %v1010_v56, 0.0 }
 0x613   : > { %v1002_v58 = vpop.f32.mrf.mxu2  ;;  %1015 = vadd.xlane.f32.xlu2 %v1014_v57 }
 0x686   : > { %v1016_v2 = vpop.xlane.xlu2 %1015 }
 0x687   : > { %v1024_v3 = vmul.f32 %v1023_v1, %v1016_v2 }
 0x689   : > { %v1025_v4 = vsub.f32 %v1010_v56, %v1024_v3 }
 0x68b   : > { %v1026_v5 = vmul.f32 %v1025_v4, %v1025_v4 }
 0x68d   : > { %v1027_v6 = vsel %vm1013_vm6, %v1026_v5, 0.0 }
 0x68e   : > { %1028 = vadd.xlane.f32.xlu2 %v1027_v6 }
 0x701   : > { %v1029_v7 = vpop.xlane.xlu2 %1028 }
 0x702   : > { %v1030_v8 = vmul.f32 %v1029_v7, %v1023_v1 }
 0x704   : > { %v1031_v9 = vadd.f32 1e-06, %v1030_v8 }
 0x706   : > { %1627 = vrsqrt.f32 %v1031_v9  ;;  %vm1038_vm9 = vweird.f32 %v1031_v9 }
 0x70c   : > { %v1628_v10 = vpop.eup %1627 }
 0x70d   : > { %v1033_v11 = vmul.f32 %v1628_v10, %v1031_v9  ;;  %vm1039_vm8 = vweird.f32 %v1628_v10 }
 0x70e   : > { %vm1040_vm10 = vmor %vm1038_vm9, %vm1039_vm8 }
 0x70f   : > { %v1034_v12 = vmul.f32 %v1628_v10, %v1033_v11 }
 0x711   : > { %v1035_v13 = vmul.f32 0.5, %v1034_v12 }
 0x713   : > { %v1036_v14 = vsub.f32 1.5, %v1035_v13 }
 0x715   : > { %v1037_v15 = vmul.f32 %v1628_v10, %v1036_v14 }
 0x717   : > { %v1041_v17 = vsel %vm1040_vm10, %v1628_v10, %v1037_v15 }
 0x718   : > { %v1042_v18 = vmul.f32 %v1041_v17, %v1025_v4 }
 0x71a   : > { %v1046_v20 = vmul.f32 %v1603_v16, %v1042_v18 }
 0x71c   : > { %v2181_v21 = vadd.f32 %v1604_v19, %v1046_v20 }
 0x71e   : > { %v1053_v23 = vsel %vm1013_vm6, %v2181_v21, 0.0 }
 0x71f   : > { %1054 = vadd.xlane.f32.xlu0 %v1053_v23 }
 0x792   : > { %v1055_v22 = vpop.xlane.xlu0 %1054 }
 0x793   : > { %v1056_v24 = vmul.f32 %v1055_v22, %v1023_v1 }
 0x795   : > { %v1057_v25 = vsub.f32 %v2181_v21, %v1056_v24 }
 0x797   : > { %v1058_v26 = vmul.f32 %v1057_v25, %v1057_v25 }
 0x799   : > { %v1059_v27 = vsel %vm1013_vm6, %v1058_v26, 0.0 }
 0x79a   : > { %1060 = vadd.xlane.f32.xlu2 %v1059_v27 }
 0x80d   : > { %v1061_v31 = vpop.xlane.xlu2 %1060 }
 0x80e   : > { %v1062_v32 = vmul.f32 %v1061_v31, %v1023_v1 }
 0x810   : > { %v1063_v34 = vadd.f32 1e-06, %v1062_v32 }
 0x812   : > { %1629 = vrsqrt.f32 %v1063_v34  ;;  %vm1070_vm12 = vweird.f32 %v1063_v34 }
 0x818   : > { %v1630_v35 = vpop.eup %1629 }
 0x819   : > { %v1065_v37 = vmul.f32 %v1630_v35, %v1063_v34  ;;  %vm1071_vm11 = vweird.f32 %v1630_v35 }
 0x81a   : > { %vm1072_vm13 = vmor %vm1070_vm12, %vm1071_vm11 }
 0x81b   : > { %v1066_v38 = vmul.f32 %v1630_v35, %v1065_v37 }
 0x81d   : > { %v1067_v36 = vmul.f32 0.5, %v1066_v38 }
 0x81f   : > { %v1068_v39 = vsub.f32 1.5, %v1067_v36 }
 0x821   : > { %v1069_v40 = vmul.f32 %v1630_v35, %v1068_v39 }
 0x823   : > { %v1073_v42 = vsel %vm1072_vm13, %v1630_v35, %v1069_v40 }
 0x824   : > { %v1074_v43 = vmul.f32 %v1073_v42, %v1057_v25 }
 0x826   : > { %v1078_v45 = vmul.f32 %v1605_v41, %v1074_v43 }
 0x828   : > { %v1082_v46 = vadd.f32 %v1606_v44, %v1078_v45 }
 0x82a   : > { %v1083_v47 = vpack.c.bf16 %v1082_v46, %v1082_v46 }
 0x82c   : > { %1441 = vmatmul.msk.bf16.vlgmr.msrb.gmra.mxu1 %vm1013_vm6, %v1083_v47 }
 0x8a9   : > { %v1116_v51 = vpop.f32.mrf.mxu1 }
 0x8aa   : > { %v1117_v52 = vadd.f32 %v1607_v50, %v1116_v51 }
 0x8ac   : > { %v1120_v53 = vmax.f32 %v1117_v52, 0.0 }
 0x8ae   : > { %v1121_v54 = vpack.c.bf16 %v1120_v53, %v1120_v53 }
 0x8b0   : > { %1458 = vmatmul.msk.bf16.vlgmr.msrb.gmra.mxu3 %vm1158_vm14, %v1121_v54 }
 0x8b1   : > { %v1118_v55 = vpop.f32.mrf.mxu1 }
 0x8b2   : > { %1748 = shalt.err (!%p1745_p2)
}
 0x8b3   : > { %s1873_s14 = smov 128   ;;  %s1874_s12 = smov 256  }
 0x8b4   : > { %s1875_s16 = smov 8   ;;  %s1461_s0 = sshll.u32 %s1843_s22, 1 }
 0x8b5   : > { %1491 = dma.vmem_to_hbm [thread:$0]  (%p2047_p0), %s1213_s7, 512, %s1215_s27, %s1183_s15, %s1873_s14, %s1874_s12, %s1875_s16  }
 0x8b6   : > { %s1193_s29 = sadd.s32 %s1839_s21, %s1461_s0  ;;  %s2345_s11 = sld [smem:[#allocation33_spill]] }
 0x8b7   : > { %s1462_s28 = sshll.u32 %s1193_s29, 3  ;;  %s2346_s10 = sld [smem:[#allocation34_spill]] }
 0x8b8   : > { %s1197_s3 = sshll.u32 %s2096_s4, 4  ;;  %s1178_s21 = scalar_lea.sflag [#allocation5], %s2074_s9  ;;  %s1198_s3 = int_to_ptr.vmem [resolvable:$true] %s1197_s3 }
 0x8bc   : > { %v1608_v56 = vld [vmem:[%s2345_s11] ss:$0 sm:$0xff] }
 0x8bd   : > { %s1195_s2 = scalar_lea.hbm %s2346_s10, %s1462_s28  ;;  %s1769_s14 = scalar_lea.hbm %s2346_s10, 32 }
 0x8be   : > { %s1199_s6 = sshll.u32 %s1195_s2, 4  ;;  %s1200_s6 = int_to_ptr.hbm [resolvable:$true] %s1199_s6 }
 0x8bf   : > { %s1763_s22 = sshra.s32 %s1200_s6, 4  ;;  %s1764_s22 = int_to_ptr.hbm [resolvable:$true] %s1763_s22 }
 0x8c0   : > { %s1765_s7 = scalar_lea.hbm %s1764_s22, 8  ;;  %p1770_p3 = scmp.lt.s32.totalorder %s1764_s22, %s2346_s10 }
 0x8c1   : > { %p1766_p4 = scmp.ne.s32.totalorder %s1764_s22, %s1765_s7  ;;  %p1771_p8 = scmp.lt.s32.totalorder %s1769_s14, %s1765_s7 }
 0x8c3   : > { %p1767_p5 = pnand %p1766_p4, %p2047_p0  ;;  %p1772_p1 = por %p1771_p8, %p1770_p3 }
 0x8c5   : > { %p1768_p7 = pneg %p1767_p5 }
 0x8c7   : > { %p1773_p9 = pnand %p1772_p1, %p1768_p7 }
 0x933   : > { %v1171_v57 = vpop.f32.mrf.mxu3 }
 0x934   : > { %v1172_v58 = vadd.f32 %v1608_v56, %v1171_v57 }
 0x936   : > { %v1175_v59 = vadd.f32 %v1172_v58, %v2181_v21 }
 0x938   : > { %1176 = vst.msk [vmem:[%s2096_s4] sm:$0xff] %vm1013_vm6, %v1175_v59 }
 0x939   : > { %1776 = shalt.err (!%p1773_p9)
}
 0x93a   : > { %1490 = dma.vmem_to_hbm [thread:$0]  (%p2047_p0), %s1198_s3, 128, %s1200_s6, %s1178_s21  }
 0x93b   : > { %v1173_v60 = vpop.f32.mrf.mxu3 }
 0x93c PF: > { %s2347_s9 = sld [smem:[#allocation16_spill]]  ;;  %p1517_p10 = scmp.ge.s32.totalorder %s1855_s25, 2 }
 0x93e   : > { %p1506_p11 = pnand %p1517_p10, %p2054_p6 }
 0x940   : > { %p1507_p12 = pneg %p1506_p11 }
 0x942   : > { %s1229_s4 = sand.u32 1, %s2347_s9  }
 0x943   : > { %s1230_s16 = scalar_lea.sflag [#allocation5], %s1229_s4 }
 0x944   : > { %1818 = dma.done.wait (%p1507_p12), %s1230_s16, 128  }
 0x945   : > { %1820 = vsyncadd (%p1507_p12), %s1230_s16, 4294967168  ;;  %s1240_s0 = scalar_lea.sflag [#allocation11], %s1229_s4 }
 0x946   : > { %1822 = dma.done.wait (%p1507_p12), %s1240_s0, 512  }
 0x947   : > { %1824 = vsyncadd (%p1507_p12), %s1240_s0, 4294966784  ;;  %s36_s25 = sadd.s32 1, %s1855_s25   ;;  %s2348_s3 = smov %s2061_s18 }
 0x948   : > { %p33_p13 = scmp.ge.s32.totalorder %s36_s25, 6   ;;  %s2349_s8 = sld [smem:[#allocation17_spill]] }
 0x949   : > { %s2350_s6 = sld [smem:[#allocation18_spill]]  ;;  %s2351_s18 = smov %s1831_s19 }
 0x94a   : > { %s2352_s19 = smov %s1835_s20  ;;  %s2353_s20 = smov %s2348_s3 }
 0x94b   : > { %s2354_s21 = smov %s1847_s23  ;;  %s2355_s22 = smov %s1851_s24 }
 0x94c   :  { %35 = sbr.rel (!%p33_p13) target bundleno = 27 (0x1b), region = 161 }
 0x94e   : > { %s2356_s23 = smov %s2349_s8 }
 0x94f   : > { %s2357_s24 = smov %s2350_s6 }
 0x951   :  { %1246 = vsyncpa [#allocation4], 1 }
 0x952   :  { %1248 = vsyncpa [#allocation4 + $0x1], 1 }
 0x953   :  { %1249 = vsyncpa [#allocation7], 1 }
 0x954   :  { %1250 = vsyncpa [#allocation5], 1 }
 0x955   :  { %1252 = vsyncpa [#allocation5 + $0x1], 1 }
 0x956   :  { %1253 = vsyncpa [#allocation11], 1 }
 0x957   :  { %1255 = vsyncpa [#allocation11 + $0x1], 1 }

</bundles_post_ra>
